<compile_context>
chip_gen: v7x
topology: tpu7x:2x2x1
jax: 0.10.0
libtpu: 0.0.40
codegen_flags: <defaults>
</compile_context>

<pallas_src>
import functools

import jax
import jax.numpy as jnp
from jax.experimental import pallas as pl
from jax.experimental.pallas import tpu as pltpu


def _round_up(x, m):
    return ((x + m - 1) // m) * m


def _next_pow2(x):
    return 1 << max(int(x) - 1, 0).bit_length()


def _vmem_capacity_bytes():
    # v7x: 64 MiB per TensorCore; v5e/v6e: 128 MiB.  Query when possible,
    # fall back to the conservative (v7x) figure.
    try:
        return int(pltpu.get_tpu_info().vmem_capacity_bytes)
    except Exception:
        return 64 << 20


# ----------------------------------------------------------------------------
# Pallas kernel: fused (1x1 conv == matmul) + folded-BN bias + ReLU stack,
# channel-first, with an elementwise running max over the point (lane) axis.
# ----------------------------------------------------------------------------
def _sa_mlp_kernel(num_inputs, num_layers, tn, n_true, n_pad, n_per_split, *refs):
    x_refs = refs[:num_inputs]                    # each (1, C_i, TN)  bf16
    w1_refs = refs[num_inputs:2 * num_inputs]     # each (C1, C_i)    bf16
    b1_ref = refs[2 * num_inputs]                 # (C1, 1)           f32
    layer_refs = refs[2 * num_inputs + 1:-2]      # (W_l bf16, b_l f32) pairs
    out_ref = refs[-2]                            # (1, 1, C_last, 1) f32
    acc_ref = refs[-1]                            # (C_last, TN)      f32 scratch

    s = pl.program_id(0)          # point-axis split (megacore) index
    n = pl.program_id(2)          # point-tile index within the split

    # ---- layer 1: sum of partial bf16 matmuls over the (xyz, points) inputs ----
    h = jnp.dot(w1_refs[0][...], x_refs[0][0],
                preferred_element_type=jnp.float32)
    for i in range(1, num_inputs):
        h = h + jnp.dot(w1_refs[i][...], x_refs[i][0],
                        preferred_element_type=jnp.float32)
    h = jnp.maximum(h + b1_ref[...], 0.0)         # (C1, TN) f32

    # ---- layers 2..L (bf16 dot inputs, f32 accumulate / bias / ReLU) ----
    for l in range(num_layers - 1):
        w = layer_refs[2 * l][...]
        b = layer_refs[2 * l + 1][...]
        h = jnp.maximum(
            jnp.dot(w, h.astype(w.dtype), preferred_element_type=jnp.float32) + b,
            0.0)

    # ---- running max into the accumulator (VPU only in the hot loop) ----
    def _update_acc(val):
        @pl.when(n == 0)
        def _():
            acc_ref[...] = val

        @pl.when(n > 0)
        def _():
            acc_ref[...] = jnp.maximum(acc_ref[...], val)

    if n_pad != n_true:
        # Only tiles that actually contain padded lanes pay the iota/cmp/select.
        # Masking to 0.0 is safe: h is post-ReLU (>= 0) so the true max is >= 0.
        g_start = (s * n_per_split + n) * tn      # global lane offset of this tile

        @pl.when(g_start + tn > n_true)
        def _():
            lane = jax.lax.broadcasted_iota(jnp.int32, h.shape, 1)
            _update_acc(jnp.where(g_start + lane < n_true, h, 0.0))

        @pl.when(g_start + tn <= n_true)
        def _():
            _update_acc(h)
    else:
        _update_acc(h)

    # ---- single cross-lane reduce per (split, batch) in the epilogue ----
    @pl.when(n == pl.num_programs(2) - 1)
    def _():
        out_ref[0, 0] = jnp.max(acc_ref[...], axis=1,
                                keepdims=True).astype(out_ref.dtype)


def _run_sa_mlp(xs, first_ws, first_b, rest):
    """xs: list of (B, C_i, N) bf16 feature tensors (channel-first).
    first_ws: per-input slices of the folded first-layer weight (bf16), (C1, C_i).
    first_b: (C1, 1) f32.  rest: list of (W bf16 (C_l, C_{l-1}), b f32 (C_l, 1)).
    Returns (B, C_last, 1) f32: max over points of the ReLU MLP stack."""
    B, _, N = xs[0].shape
    num_inputs = len(xs)
    num_layers = 1 + len(rest)
    C_in_total = sum(x.shape[1] for x in xs)
    layer_out_channels = [first_ws[0].shape[0]] + [w.shape[0] for (w, _) in rest]
    C_last = layer_out_channels[-1]
    x_dsize = jnp.dtype(xs[0].dtype).itemsize

    # ---- per-chip VMEM budget and point-tile size ---------------------------
    capacity = _vmem_capacity_bytes()
    budget = capacity // 2                        # leave headroom for the compiler
    n_pad128 = _round_up(N, 128)

    def footprint(tn):
        return (3 * C_in_total * tn * x_dsize          # Buffered(3) activation tiles
                + sum(layer_out_channels) * tn * 4     # f32 intermediates
                + C_last * tn * 4)                     # running-max accumulator

    tn_max = min(8192, _next_pow2(n_pad128))
    TN = 128
    cand = 128
    while cand <= tn_max:
        if footprint(cand) <= budget:
            TN = cand
        cand *= 2

    # v7x megacore: with B == 1 split the point tiles across two TensorCores
    # (leading "parallel" grid axis); harmless serial overhead on v5e/v6e.
    SPLIT = 2 if (B == 1 and n_pad128 > TN) else 1

    N_pad = _round_up(n_pad128, SPLIT * TN)
    if N_pad != N:
        xs = [jnp.pad(x, ((0, 0), (0, 0), (0, N_pad - N))) for x in xs]
    n_per_split = N_pad // (SPLIT * TN)
    grid = (SPLIT, B, n_per_split)

    fp = footprint(TN)
    vmem_limit = int(min(int(capacity * 0.9), max(32 << 20, 2 * fp + (16 << 20))))

    kernel = functools.partial(_sa_mlp_kernel, num_inputs, num_layers,
                               TN, N, N_pad, n_per_split)

    def build_and_call(input_buffer_count):
        in_specs, args = [], []
        for x in xs:
            C_i = x.shape[1]
            idx = lambda s, b, n, _nps=n_per_split: (b, 0, s * _nps + n)
            if input_buffer_count > 2:
                spec = pl.BlockSpec((1, C_i, TN), idx,
                                    pipeline_mode=pl.Buffered(input_buffer_count))
            else:
                spec = pl.BlockSpec((1, C_i, TN), idx)
            in_specs.append(spec)
            args.append(x)
        for w in first_ws:
            in_specs.append(pl.BlockSpec(w.shape, lambda s, b, n: (0, 0)))
            args.append(w)
        in_specs.append(pl.BlockSpec(first_b.shape, lambda s, b, n: (0, 0)))
        args.append(first_b)
        for w, bias in rest:
            in_specs.append(pl.BlockSpec(w.shape, lambda s, b, n: (0, 0)))
            args.append(w)
            in_specs.append(pl.BlockSpec(bias.shape, lambda s, b, n: (0, 0)))
            args.append(bias)

        return pl.pallas_call(
            kernel,
            out_shape=jax.ShapeDtypeStruct((SPLIT, B, C_last, 1), jnp.float32),
            grid=grid,
            in_specs=in_specs,
            out_specs=pl.BlockSpec((1, 1, C_last, 1), lambda s, b, n: (s, b, 0, 0)),
            scratch_shapes=[pltpu.VMEM((C_last, TN), jnp.float32)],
            compiler_params=pltpu.CompilerParams(
                dimension_semantics=("parallel", "parallel", "arbitrary"),
                vmem_limit_bytes=vmem_limit),
        )(*args)

    try:
        out = build_and_call(3)      # deeper input pipelining on the activation stream
    except Exception:
        out = build_and_call(2)      # fall back to the default 2-deep pipeline

    # Combine per-split partial maxima (no-op squeeze when SPLIT == 1).
    return jnp.max(out, axis=0)      # (B, C_last, 1)


# ----------------------------------------------------------------------------
# Module wrapper (parameter setup + glue in plain JAX).
# ----------------------------------------------------------------------------
class PointNetSetAbstractionPallas:
    def __init__(self, npoint, radius, nsample, in_channel, mlp, group_all, key):
        assert group_all, "only the group_all=True path is implemented"
        self.npoint, self.radius, self.nsample = npoint, radius, nsample
        self.group_all = group_all
        self.in_channel = in_channel
        self.eps = 1e-5

        self.params = []  # per layer: (conv_w (Cout,Cin), conv_b, gamma, beta, mean, var)
        last = in_channel
        for out_c in mlp:
            key, k1, k2, k3, k4, k5, k6 = jax.random.split(key, 7)
            conv_w = 0.1 * jax.random.normal(k1, (out_c, last), jnp.float32)
            conv_b = 0.1 * jax.random.normal(k2, (out_c,), jnp.float32)
            gamma = 1.0 + 0.1 * jax.random.normal(k3, (out_c,), jnp.float32)
            beta = 0.1 * jax.random.normal(k4, (out_c,), jnp.float32)
            r_mean = 0.1 * jax.random.normal(k5, (out_c,), jnp.float32)
            r_var = jnp.abs(1.0 + 0.1 * jax.random.normal(k6, (out_c,), jnp.float32))
            self.params.append((conv_w, conv_b, gamma, beta, r_mean, r_var))
            last = out_c

    def _folded(self):
        """Fold eval-mode BN into the 1x1 conv. Returns list of (W (Cout,Cin), b (Cout,1))."""
        folded = []
        for conv_w, conv_b, gamma, beta, r_mean, r_var in self.params:
            scale = gamma / jnp.sqrt(r_var + self.eps)            # (Cout,)
            W_eff = scale[:, None] * conv_w                       # (Cout, Cin)
            b_eff = (scale * (conv_b - r_mean) + beta)[:, None]   # (Cout, 1)
            folded.append((W_eff, b_eff))
        return folded

    def __call__(self, xyz, points):
        # xyz: (B, 3, N); points: (B, D, N) or None (PyTorch channel-first input).
        B, _, N = xyz.shape
        folded = self._folded()
        (W1, b1), rest = folded[0], folded[1:]

        # bf16 activations & matmul weights (halves HBM traffic, bf16-native MXU);
        # biases / ReLU / masking / running max stay in f32 inside the kernel.
        xs = [xyz.astype(jnp.bfloat16)]
        first_ws = [W1[:, :3].astype(jnp.bfloat16)]
        if points is not None:
            xs.append(points.astype(jnp.bfloat16))
            first_ws.append(W1[:, 3:].astype(jnp.bfloat16))
        rest_bf16 = [(w.astype(jnp.bfloat16), b.astype(jnp.float32)) for (w, b) in rest]

        new_points = _run_sa_mlp(xs, first_ws, b1.astype(jnp.float32), rest_bf16)
        new_xyz = jnp.zeros((B, 3, 1), jnp.float32)   # zeros(B,1,3) permuted
        return new_xyz, new_points


# ----------------------------------------------------------------------------
# Pure-JAX f32 reference of the same forward (for verification).
# ----------------------------------------------------------------------------
def _reference(module, xyz, points):
    x = xyz.astype(jnp.float32)
    if points is not None:
        x = jnp.concatenate([x, points.astype(jnp.float32)], axis=1)   # (B, C_in, N)
    h = x
    for W, b in module._folded():
        h = jnp.maximum(jnp.einsum("oc,bcn->bon", W, h) + b[None], 0.0)
    return jnp.max(h, axis=2, keepdims=True)   # (B, C_last, 1)


if __name__ == "__main__":
    key = jax.random.PRNGKey(0)
    k_xyz, k_pts, k_mod = jax.random.split(key, 3)

    # N deliberately not a multiple of 128 -> exercises padding + masked tiles.
    B, N, D = 2, 1900, 4                  # in_channel = 3 + D
    xyz = jax.random.normal(k_xyz, (B, 3, N), jnp.float32)
    points = jax.random.normal(k_pts, (B, D, N), jnp.float32)

    module = PointNetSetAbstractionPallas(
        npoint=None, radius=None, nsample=None,
        in_channel=3 + D, mlp=[32, 64], group_all=True, key=k_mod)

    new_xyz, new_points = module(xyz, points)
    new_xyz = jax.block_until_ready(new_xyz)
    new_points = jax.block_until_ready(new_points)

    ref = _reference(module, xyz, points)
    assert new_xyz.shape == (B, 3, 1)
    assert new_points.shape == (B, 64, 1)
    # bf16 matmul inputs vs f32 reference -> loosened tolerance.
    assert jnp.allclose(new_points, ref, atol=5e-2, rtol=5e-2), \
        float(jnp.max(jnp.abs(new_points - ref)))

    print("KERNEL_OK")
</pallas_src>

<mosaic_0001>
module attributes {stable_mosaic.version = 11 : i64} {
  func.func @_sa_mlp_kernel(%arg0: i32, %arg1: i32, %arg2: i32, %arg3: memref<1x3x2048xbf16, #tpu.memory_space<vmem>>, %arg4: memref<1x4x2048xbf16, #tpu.memory_space<vmem>>, %arg5: memref<32x3xbf16, #tpu.memory_space<vmem>>, %arg6: memref<32x4xbf16, #tpu.memory_space<vmem>>, %arg7: memref<32x1xf32, #tpu.memory_space<vmem>>, %arg8: memref<64x32xbf16, #tpu.memory_space<vmem>>, %arg9: memref<64x1xf32, #tpu.memory_space<vmem>>, %arg10: memref<1x1x64x1xf32, #tpu.memory_space<vmem>>, %arg11: memref<64x2048xf32, #tpu.memory_space<vmem>>) attributes {dimension_semantics = [#tpu.dimension_semantics<parallel>, #tpu.dimension_semantics<parallel>, #tpu.dimension_semantics<arbitrary>], iteration_bounds = array<i64: 1, 2, 1>, scalar_prefetch = 0 : i64, scratch_operands = 1 : i64, tpu.core_type = #tpu.core_type<tc>, window_params = [{transform_indices = @transform_0, window_bounds = array<i64: 1, 3, 2048>}, {transform_indices = @transform_1, window_bounds = array<i64: 1, 4, 2048>}, {pipeline_mode = #tpu.pipeline_mode<synchronous>, transform_indices = @transform_2, window_bounds = array<i64: 32, 3>}, {pipeline_mode = #tpu.pipeline_mode<synchronous>, transform_indices = @transform_3, window_bounds = array<i64: 32, 4>}, {pipeline_mode = #tpu.pipeline_mode<synchronous>, transform_indices = @transform_4, window_bounds = array<i64: 32, 1>}, {pipeline_mode = #tpu.pipeline_mode<synchronous>, transform_indices = @transform_5, window_bounds = array<i64: 64, 32>}, {pipeline_mode = #tpu.pipeline_mode<synchronous>, transform_indices = @transform_6, window_bounds = array<i64: 64, 1>}, {transform_indices = @transform_7, window_bounds = array<i64: 1, 1, 64, 1>}]} {
    %c0 = arith.constant 0 : index
    %c0_0 = arith.constant 0 : index
    %0 = vector.load %arg5[%c0, %c0_0] : memref<32x3xbf16, #tpu.memory_space<vmem>>, vector<32x3xbf16>
    %c0_1 = arith.constant 0 : index
    %c0_2 = arith.constant 0 : index
    %c0_3 = arith.constant 0 : index
    %1 = vector.load %arg3[%c0_1, %c0_2, %c0_3] : memref<1x3x2048xbf16, #tpu.memory_space<vmem>>, vector<1x3x2048xbf16>
    %2 = vector.shape_cast %1 : vector<1x3x2048xbf16> to vector<3x2048xbf16>
    %cst = arith.constant dense<0.000000e+00> : vector<32x2048xf32>
    %3 = tpu.matmul %0, %2, %cst {dimension_numbers = #tpu.dot_dimension_numbers<[1], [0], [0], [1], [0, 0, 1, 1], [], []>} : vector<32x3xbf16>, vector<3x2048xbf16>, vector<32x2048xf32> -> vector<32x2048xf32>
    %c0_4 = arith.constant 0 : index
    %c0_5 = arith.constant 0 : index
    %4 = vector.load %arg6[%c0_4, %c0_5] : memref<32x4xbf16, #tpu.memory_space<vmem>>, vector<32x4xbf16>
    %c0_6 = arith.constant 0 : index
    %c0_7 = arith.constant 0 : index
    %c0_8 = arith.constant 0 : index
    %5 = vector.load %arg4[%c0_6, %c0_7, %c0_8] : memref<1x4x2048xbf16, #tpu.memory_space<vmem>>, vector<1x4x2048xbf16>
    %6 = vector.shape_cast %5 : vector<1x4x2048xbf16> to vector<4x2048xbf16>
    %cst_9 = arith.constant dense<0.000000e+00> : vector<32x2048xf32>
    %7 = tpu.matmul %4, %6, %cst_9 {dimension_numbers = #tpu.dot_dimension_numbers<[1], [0], [0], [1], [0, 0, 1, 1], [], []>} : vector<32x4xbf16>, vector<4x2048xbf16>, vector<32x2048xf32> -> vector<32x2048xf32>
    %8 = arith.addf %3, %7 : vector<32x2048xf32>
    %c0_10 = arith.constant 0 : index
    %c0_11 = arith.constant 0 : index
    %9 = vector.load %arg7[%c0_10, %c0_11] : memref<32x1xf32, #tpu.memory_space<vmem>>, vector<32x1xf32>
    %10 = vector.broadcast %9 : vector<32x1xf32> to vector<32x2048xf32>
    %11 = arith.addf %8, %10 : vector<32x2048xf32>
    %cst_12 = arith.constant 0.000000e+00 : f32
    %12 = vector.broadcast %cst_12 : f32 to vector<32x2048xf32>
    %13 = arith.maximumf %11, %12 : vector<32x2048xf32>
    %c0_13 = arith.constant 0 : index
    %c0_14 = arith.constant 0 : index
    %14 = vector.load %arg8[%c0_13, %c0_14] : memref<64x32xbf16, #tpu.memory_space<vmem>>, vector<64x32xbf16>
    %c0_15 = arith.constant 0 : index
    %c0_16 = arith.constant 0 : index
    %15 = vector.load %arg9[%c0_15, %c0_16] : memref<64x1xf32, #tpu.memory_space<vmem>>, vector<64x1xf32>
    %16 = arith.truncf %13 : vector<32x2048xf32> to vector<32x2048xbf16>
    %cst_17 = arith.constant dense<0.000000e+00> : vector<64x2048xf32>
    %17 = tpu.matmul %14, %16, %cst_17 {dimension_numbers = #tpu.dot_dimension_numbers<[1], [0], [0], [1], [0, 0, 1, 1], [], []>} : vector<64x32xbf16>, vector<32x2048xbf16>, vector<64x2048xf32> -> vector<64x2048xf32>
    %18 = vector.broadcast %15 : vector<64x1xf32> to vector<64x2048xf32>
    %19 = arith.addf %17, %18 : vector<64x2048xf32>
    %cst_18 = arith.constant 0.000000e+00 : f32
    %20 = vector.broadcast %cst_18 : f32 to vector<64x2048xf32>
    %21 = arith.maximumf %19, %20 : vector<64x2048xf32>
    %c1_i32 = arith.constant 1 : i32
    %22 = arith.muli %arg0, %c1_i32 : i32
    %23 = arith.addi %22, %arg2 : i32
    %c2048_i32 = arith.constant 2048 : i32
    %24 = arith.muli %23, %c2048_i32 : i32
    %c2048_i32_19 = arith.constant 2048 : i32
    %25 = arith.addi %24, %c2048_i32_19 : i32
    %c1900_i32 = arith.constant 1900 : i32
    %26 = arith.cmpi sgt, %25, %c1900_i32 : i32
    %27 = arith.extui %26 : i1 to i32
    %c0_i32 = arith.constant 0 : i32
    %28 = arith.cmpi ne, %27, %c0_i32 : i32
    scf.if %28 {
      %36 = tpu.iota {dimensions = array<i32: 1>} : vector<64x2048xi32>
      %37 = vector.broadcast %24 : i32 to vector<64x2048xi32>
      %38 = arith.addi %37, %36 : vector<64x2048xi32>
      %c1900_i32_25 = arith.constant 1900 : i32
      %39 = vector.broadcast %c1900_i32_25 : i32 to vector<64x2048xi32>
      %40 = arith.cmpi slt, %38, %39 : vector<64x2048xi32>
      %cst_26 = arith.constant 0.000000e+00 : f32
      %41 = vector.broadcast %cst_26 : f32 to vector<64x2048xf32>
      %42 = arith.select %40, %21, %41 : vector<64x2048xi1>, vector<64x2048xf32>
      %c0_i32_27 = arith.constant 0 : i32
      %43 = arith.cmpi eq, %arg2, %c0_i32_27 : i32
      %44 = arith.extui %43 : i1 to i32
      %c0_i32_28 = arith.constant 0 : i32
      %45 = arith.cmpi ne, %44, %c0_i32_28 : i32
      scf.if %45 {
        %c0_31 = arith.constant 0 : index
        %c0_32 = arith.constant 0 : index
        %49 = vector.load %arg11[%c0_31, %c0_32] : memref<64x2048xf32, #tpu.memory_space<vmem>>, vector<64x2048xf32>
        tpu.vector_store %arg11[%c0_31, %c0_32], %42 {strides = array<i32>} : memref<64x2048xf32, #tpu.memory_space<vmem>>, vector<64x2048xf32>,
      } else {
      }
      %c0_i32_29 = arith.constant 0 : i32
      %46 = arith.cmpi sgt, %arg2, %c0_i32_29 : i32
      %47 = arith.extui %46 : i1 to i32
      %c0_i32_30 = arith.constant 0 : i32
      %48 = arith.cmpi ne, %47, %c0_i32_30 : i32
      scf.if %48 {
        %c0_31 = arith.constant 0 : index
        %c0_32 = arith.constant 0 : index
        %49 = vector.load %arg11[%c0_31, %c0_32] : memref<64x2048xf32, #tpu.memory_space<vmem>>, vector<64x2048xf32>
        %50 = arith.maximumf %49, %42 : vector<64x2048xf32>
        %c0_33 = arith.constant 0 : index
        %c0_34 = arith.constant 0 : index
        %51 = vector.load %arg11[%c0_33, %c0_34] : memref<64x2048xf32, #tpu.memory_space<vmem>>, vector<64x2048xf32>
        tpu.vector_store %arg11[%c0_33, %c0_34], %50 {strides = array<i32>} : memref<64x2048xf32, #tpu.memory_space<vmem>>, vector<64x2048xf32>,
      } else {
      }
    } else {
    }
    %c2048_i32_20 = arith.constant 2048 : i32
    %29 = arith.addi %24, %c2048_i32_20 : i32
    %c1900_i32_21 = arith.constant 1900 : i32
    %30 = arith.cmpi sle, %29, %c1900_i32_21 : i32
    %31 = arith.extui %30 : i1 to i32
    %c0_i32_22 = arith.constant 0 : i32
    %32 = arith.cmpi ne, %31, %c0_i32_22 : i32
    scf.if %32 {
      %c0_i32_25 = arith.constant 0 : i32
      %36 = arith.cmpi eq, %arg2, %c0_i32_25 : i32
      %37 = arith.extui %36 : i1 to i32
      %c0_i32_26 = arith.constant 0 : i32
      %38 = arith.cmpi ne, %37, %c0_i32_26 : i32
      scf.if %38 {
        %c0_29 = arith.constant 0 : index
        %c0_30 = arith.constant 0 : index
        %42 = vector.load %arg11[%c0_29, %c0_30] : memref<64x2048xf32, #tpu.memory_space<vmem>>, vector<64x2048xf32>
        tpu.vector_store %arg11[%c0_29, %c0_30], %21 {strides = array<i32>} : memref<64x2048xf32, #tpu.memory_space<vmem>>, vector<64x2048xf32>,
      } else {
      }
      %c0_i32_27 = arith.constant 0 : i32
      %39 = arith.cmpi sgt, %arg2, %c0_i32_27 : i32
      %40 = arith.extui %39 : i1 to i32
      %c0_i32_28 = arith.constant 0 : i32
      %41 = arith.cmpi ne, %40, %c0_i32_28 : i32
      scf.if %41 {
        %c0_29 = arith.constant 0 : index
        %c0_30 = arith.constant 0 : index
        %42 = vector.load %arg11[%c0_29, %c0_30] : memref<64x2048xf32, #tpu.memory_space<vmem>>, vector<64x2048xf32>
        %43 = arith.maximumf %42, %21 : vector<64x2048xf32>
        %c0_31 = arith.constant 0 : index
        %c0_32 = arith.constant 0 : index
        %44 = vector.load %arg11[%c0_31, %c0_32] : memref<64x2048xf32, #tpu.memory_space<vmem>>, vector<64x2048xf32>
        tpu.vector_store %arg11[%c0_31, %c0_32], %43 {strides = array<i32>} : memref<64x2048xf32, #tpu.memory_space<vmem>>, vector<64x2048xf32>,
      } else {
      }
    } else {
    }
    %c0_i32_23 = arith.constant 0 : i32
    %33 = arith.cmpi eq, %arg2, %c0_i32_23 : i32
    %34 = arith.extui %33 : i1 to i32
    %c0_i32_24 = arith.constant 0 : i32
    %35 = arith.cmpi ne, %34, %c0_i32_24 : i32
    scf.if %35 {
      %c0_25 = arith.constant 0 : index
      %c0_26 = arith.constant 0 : index
      %36 = vector.load %arg11[%c0_25, %c0_26] : memref<64x2048xf32, #tpu.memory_space<vmem>>, vector<64x2048xf32>
      %cst_27 = arith.constant dense<0xFF800000> : vector<64xf32>
      %37 = vector.multi_reduction <maximumf>, %36, %cst_27 [1] : vector<64x2048xf32> to vector<64xf32>
      %38 = vector.shape_cast %37 : vector<64xf32> to vector<64x1xf32>
      %c0_28 = arith.constant 0 : index
      %c0_29 = arith.constant 0 : index
      %c0_30 = arith.constant 0 : index
      %c0_31 = arith.constant 0 : index
      %39 = vector.load %arg10[%c0_28, %c0_29, %c0_30, %c0_31] : memref<1x1x64x1xf32, #tpu.memory_space<vmem>>, vector<1x1x64x1xf32>
      %40 = vector.shape_cast %39 : vector<1x1x64x1xf32> to vector<64x1xf32>
      %41 = vector.shape_cast %38 : vector<64x1xf32> to vector<1x1x64x1xf32>
      tpu.vector_store %arg10[%c0_28, %c0_29, %c0_30, %c0_31], %41 {strides = array<i32>} : memref<1x1x64x1xf32, #tpu.memory_space<vmem>>, vector<1x1x64x1xf32>,
    } else {
    }
    return
  }
  func.func @transform_0(%arg0: i32, %arg1: i32, %arg2: i32) -> (i32, i32, i32) {
    %c1_i32 = arith.constant 1 : i32
    %0 = arith.muli %arg0, %c1_i32 : i32
    %1 = arith.addi %0, %arg2 : i32
    %c0_i32 = arith.constant 0 : i32
    %c0_i32_0 = arith.constant 0 : i32
    return %arg1, %c0_i32, %1 : i32, i32, i32
  }
  func.func @transform_1(%arg0: i32, %arg1: i32, %arg2: i32) -> (i32, i32, i32) {
    %c1_i32 = arith.constant 1 : i32
    %0 = arith.muli %arg0, %c1_i32 : i32
    %1 = arith.addi %0, %arg2 : i32
    %c0_i32 = arith.constant 0 : i32
    %c0_i32_0 = arith.constant 0 : i32
    return %arg1, %c0_i32, %1 : i32, i32, i32
  }
  func.func @transform_2(%arg0: i32, %arg1: i32, %arg2: i32) -> (i32, i32) {
    %c0_i32 = arith.constant 0 : i32
    %c0_i32_0 = arith.constant 0 : i32
    %c0_i32_1 = arith.constant 0 : i32
    return %c0_i32, %c0_i32_0 : i32, i32
  }
  func.func @transform_3(%arg0: i32, %arg1: i32, %arg2: i32) -> (i32, i32) {
    %c0_i32 = arith.constant 0 : i32
    %c0_i32_0 = arith.constant 0 : i32
    %c0_i32_1 = arith.constant 0 : i32
    return %c0_i32, %c0_i32_0 : i32, i32
  }
  func.func @transform_4(%arg0: i32, %arg1: i32, %arg2: i32) -> (i32, i32) {
    %c0_i32 = arith.constant 0 : i32
    %c0_i32_0 = arith.constant 0 : i32
    %c0_i32_1 = arith.constant 0 : i32
    return %c0_i32, %c0_i32_0 : i32, i32
  }
  func.func @transform_5(%arg0: i32, %arg1: i32, %arg2: i32) -> (i32, i32) {
    %c0_i32 = arith.constant 0 : i32
    %c0_i32_0 = arith.constant 0 : i32
    %c0_i32_1 = arith.constant 0 : i32
    return %c0_i32, %c0_i32_0 : i32, i32
  }
  func.func @transform_6(%arg0: i32, %arg1: i32, %arg2: i32) -> (i32, i32) {
    %c0_i32 = arith.constant 0 : i32
    %c0_i32_0 = arith.constant 0 : i32
    %c0_i32_1 = arith.constant 0 : i32
    return %c0_i32, %c0_i32_0 : i32, i32
  }
  func.func @transform_7(%arg0: i32, %arg1: i32, %arg2: i32) -> (i32, i32, i32, i32) {
    %c0_i32 = arith.constant 0 : i32
    %c0_i32_0 = arith.constant 0 : i32
    %c0_i32_1 = arith.constant 0 : i32
    return %arg0, %arg1, %c0_i32, %c0_i32_0 : i32, i32, i32, i32
  }
}

</mosaic_0001>

<bundles_post_ra>
// kernel: tpu_custom_call.1
= control target key start
LH: loop header
LB: loop body
LE: loop exit
PB: predicated region body
PF: predicated region fallthrough
CT: control target
= control target key end

     0   :  { %s4390_s24 = smov 0   ;;  %s4392_s25 = smov 0   ;;  %s5082_s0 = inlined_call_operand.vmem [shape: bf16[2,3,2048], index: 0, kind: input, shape index: {}]   ;;  %s5083_s1 = inlined_call_operand.vmem [shape: bf16[2,4,2048], index: 1, kind: input, shape index: {}]   ;;  %s5084_s2 = inlined_call_operand.vmem [shape: bf16[32,3], index: 2, kind: input, shape index: {}]   ;;  %s5085_s3 = inlined_call_operand.vmem [shape: bf16[32,4], index: 3, kind: input, shape index: {}]   ;;  %s5086_s4 = inlined_call_operand.vmem [shape: f32[32,1], index: 4, kind: input, shape index: {}]   ;;  %s5087_s5 = inlined_call_operand.vmem [shape: bf16[64,32], index: 5, kind: input, shape index: {}]   ;;  %s5088_s6 = inlined_call_operand.vmem [shape: f32[64,1], index: 6, kind: input, shape index: {}]   ;;  %s5089_s7 = inlined_call_operand.vmem [shape: f32[1,2,64,1], index: 7, kind: output, shape index: {}]  }
   0x1   :  { %s4394_s26 = smov 0  }
   0x2 LB: > { %s32_s27 = sadd.s32 1, %s4341_s25  ;;  %p4122_p0 = scmp.ge.s32.totalorder %s4345_s26, 1  ;;  %s4345_s26 = sphi %s4394_s26, %s17_s26   ;;  %s4341_s25 = sphi %s4392_s25, %s5091_s25   ;;  %s4337_s24 = sphi %s4390_s24, %s5090_s24  }
   0x3   : > { %p34_p1 = scmp.ge.s32.totalorder %s32_s27, 2  ;;  %p290_p2 = scmp.lt.s32.totalorder %s4345_s26, 3 }
   0x5   : > { %s5093_s27 = smov (%p34_p1, %s32_s27), 0  ;;  %p291_p3 = pnand %p4122_p0, %p290_p2 }
   0x6   : > { %p343_p4 = scmp.lt.s32.totalorder (!%p291_p3), %s4337_s24, 1  ;;  %v409_v0 = vlaneseq (!%p291_p3)  ;;  %v4347_v1 = vmov (!%p291_p3), 1983009808   ;;  %v4348_v3 = vmov (!%p291_p3), 0   ;;  %vm480_vm0 = vcmask (!%p291_p3), 1041408   ;;  %v1517_v20 = vld [vmem:[%s5086_s4] sm:$0xff] (!%p291_p3) }
   0x7   : > { %294 = sbr.rel (%p291_p3) target bundleno = 812 (0x32c), region = 48  ;;  %v407_v2 = vunpack.c.l.s4 (!%p291_p3), %v4347_v1  ;;  %561 = vmatprep.mubr.bf16.mxu0 (!%p291_p3), %v4348_v3  ;;  %614 = vmatprep.mubr.bf16.mxu1 (!%p291_p3), %v4348_v3  ;;  %v1519_v21 = vld [vmem:[%s5086_s4 + $0x10] sm:$0xff] (!%p291_p3)  ;;  %v4447_v25 = vld [vmem:[%s5085_s3] sm:$0xff] (!%p291_p3)   ;;  %v1518_v27 = vld [vmem:[%s5086_s4 + $0x8] sm:$0xff] (!%p291_p3)  ;;  %vm473_vm1 = vcmask (!%p291_p3), 31744   ;;  %vm1042_vm2 = vcmask (!%p291_p3), 1040384  }
   0x8   : > { %v410_v4 = vshrl.u32 (!%p291_p3), %v409_v0, 7  ;;  %4305 = vset.pattern.permute.xlu0 (!%p291_p3), %v4348_v3  ;;  %4306 = vset.pattern.permute.xlu1 (!%p291_p3), %v4348_v3  ;;  %v1677_v34 = vld [vmem:[%s5088_s6] sm:$0xff] (!%p291_p3)  ;;  %v1520_v35 = vld [vmem:[%s5086_s4 + $0x18] sm:$0xff] (!%p291_p3)  ;;  %v4486_v36 = vld [vmem:[%s5085_s3 + $0x8] sm:$0xff] (!%p291_p3)   ;;  %v4349_v38 = vmov (!%p291_p3), 65535   ;;  %vm1035_vm3 = vcmask (!%p291_p3), 23552  }
   0x9   : > { %v408_v5 = vunpack.c.0.s8 (!%p291_p3), %v407_v2  ;;  %1523 = vperm.xlu0 (!%p291_p3), %4305, %v1517_v20   ;;  %1533 = vperm.xlu1 (!%p291_p3), %4306, %v1519_v21   ;;  %v1043_v39 = vsel (!%p291_p3), %vm1042_vm2, 4294967295, %v4349_v38  ;;  %v1679_v41 = vld [vmem:[%s5088_s6 + $0x10] sm:$0xff] (!%p291_p3)  ;;  %v1678_v43 = vld [vmem:[%s5088_s6 + $0x8] sm:$0xff] (!%p291_p3)  ;;  %v1681_v48 = vld [vmem:[%s5088_s6 + $0x20] sm:$0xff] (!%p291_p3)  ;;  %vm1777_vm4 = vcmask (!%p291_p3), 261120   ;;  %vm3999_vm6 = vcmask (!%p291_p3), 7168  }
   0xa   : > { %v4504_v45 = vsel (!%p291_p3), %vm480_vm0, %v1043_v39, 0  ;;  %v1680_v49 = vld [vmem:[%s5088_s6 + $0x18] sm:$0xff] (!%p291_p3)  ;;  %v1683_v56 = vld [vmem:[%s5088_s6 + $0x30] sm:$0xff] (!%p291_p3)  ;;  %v1682_v57 = vld [vmem:[%s5088_s6 + $0x28] sm:$0xff] (!%p291_p3) }
   0xb   : > { %v4423_v6 = vsub.s32 (!%p291_p3), %v408_v5, %v410_v4  ;;  %v1684_v60 = vld [vmem:[%s5088_s6 + $0x38] sm:$0xff] (!%p291_p3) }
   0xd   : > { %1528 = vperm.xlu0 (!%p291_p3), %4305, %v1518_v27   ;;  %1538 = vperm.xlu1 (!%p291_p3), %4306, %v1520_v35  }
   0xe   : > { %s5095_s24 = smov (!%p343_p4, %s4337_s24), 1 }
   0xf   : > { %s4211_s28 = sshll.u32 %s5095_s24, 5  ;;  %s4213_s14 = sshll.u32 %s5095_s24, 6 }
  0x10   : > { %s4421_s8 = scalar_lea.vmem %s5083_s1, %s4211_s28  ;;  %s4467_s19 = scalar_lea.vmem %s5082_s0, %s4211_s28 }
  0x11   : > { %v387_v7 = vld [vmem:[%s4421_s8] sm:$0xff]  ;;  %v388_v8 = vld [vmem:[%s4421_s8 + $0x8] sm:$0xff]  ;;  %v389_v9 = vld [vmem:[%s4421_s8 + $0x10] sm:$0xff]  ;;  %1719 = vperm.xlu0 %4305, %v1677_v34   ;;  %1724 = vperm.xlu1 %4306, %v1678_v43   ;;  %s373_s17 = scalar_lea.vmem %s5089_s7, %s4213_s14 }
  0x12   : > { %v412_v10 = vrot.slane %v387_v7, %v4423_v6  ;;  %v405_v11 = vcombine.high %v387_v7, %v387_v7  ;;  %v429_v12 = vrot.slane %v388_v8, %v4423_v6  ;;  %v422_v13 = vcombine.high %v388_v8, %v388_v8  ;;  %v4474_v33 = vld [vmem:[%s4467_s19 + $0x18] sm:$0xff]  ;;  %v379_v55 = vld [vmem:[%s4467_s19] sm:$0xff]  ;;  %v380_v7 = vld [vmem:[%s4467_s19 + $0x8] sm:$0xff] }
  0x13   : > { %v4431_v14 = vrot.slane %v389_v9, %v4423_v6  ;;  %v439_v15 = vcombine.high %v389_v9, %v389_v9  ;;  %v390_v37 = vld [vmem:[%s4421_s8 + $0x18] sm:$0xff]  ;;  %v1018_v40 = vcombine.high %v4474_v33, %v4474_v33  ;;  %v967_v58 = vcombine.high %v379_v55, %v379_v55 }
  0x14   : > { %v420_v16 = vcombine.high %v412_v10, %v412_v10  ;;  %v482_v17 = vsel %vm480_vm0, %v412_v10, 0  ;;  %v419_v18 = vrot.slane %v405_v11, %v4423_v6  ;;  %v437_v19 = vcombine.high %v429_v12, %v429_v12 }
  0x15   : > { %v436_v22 = vrot.slane %v422_v13, %v4423_v6  ;;  %v453_v26 = vrot.slane %v439_v15, %v4423_v6  ;;  %v494_v29 = vsel %vm480_vm0, %v429_v12, 0  ;;  %v454_v30 = vcombine.high %v4431_v14, %v4431_v14  ;;  %1729 = vperm.xlu0 %4305, %v1679_v41   ;;  %1734 = vperm.xlu1 %4306, %v1680_v49  }
  0x16   : > { %4131 = vmatprep.subr.msk.bf16.mxu0 %vm480_vm0, %v420_v16  ;;  %v421_v23 = vcombine.high %v419_v18, %v419_v18  ;;  %v488_v24 = vsel %vm480_vm0, %v419_v18, 0  ;;  %v4496_v42 = vrot.slane %v1018_v40, %v4423_v6  ;;  %v456_v44 = vcombine.high %v390_v37, %v390_v37 }
  0x17   : > { %530 = vmatpush1.bf16.msra.mxu0 %v482_v17  ;;  %v438_v28 = vcombine.high %v436_v22, %v436_v22  ;;  %v500_v31 = vsel %vm480_vm0, %v436_v22, 0  ;;  %v455_v32 = vcombine.high %v453_v26, %v453_v26  ;;  %v463_v47 = vrot.slane %v390_v37, %v4423_v6  ;;  %v381_v17 = vld [vmem:[%s4467_s19 + $0x10] sm:$0xff]  ;;  %v4314_v22 = vld [vmem:[%s5084_s2] sm:$0xff]  }
  0x18   : > { %4134 = vmatprep.subr.msk.bf16.mxu1 %vm480_vm0, %v421_v23  ;;  %4137 = vmatprep.subr.msk.bf16.mxu0 %vm480_vm0, %v437_v19  ;;  %v1088_v46 = vand.u32 %v4504_v45, %v4496_v42  ;;  %v470_v50 = vrot.slane %v456_v44, %v4423_v6  ;;  %v506_v51 = vsel %vm480_vm0, %v4431_v14, 0  ;;  %v512_v53 = vsel %vm480_vm0, %v453_v26, 0 }
  0x19   : > { %583 = vmatpush1.bf16.msra.mxu1 %v488_v24  ;;  %1739 = vperm.xlu0 %4305, %v1681_v48   ;;  %v471_v52 = vcombine.high %v463_v47, %v463_v47  ;;  %v974_v59 = vrot.slane %v379_v55, %v4423_v6  ;;  %v981_v61 = vrot.slane %v967_v58, %v4423_v6  ;;  %v518_v1 = vsel %vm480_vm0, %v463_v47, 0 }
  0x1a   : > { %4132 = vmatmul.mubr.msk.bf16.vlgmr.msra.gmra.mrb[0].mxu0 %vm473_vm1, %v4447_v25  ;;  %4140 = vmatprep.subr.msk.bf16.mxu1 %vm480_vm0, %v438_v28  ;;  %v472_v54 = vcombine.high %v470_v50, %v470_v50  ;;  %v524_v4 = vsel %vm480_vm0, %v470_v50, 0  ;;  %v984_v8 = vcombine.high %v380_v7, %v380_v7  ;;  %v991_v9 = vrot.slane %v380_v7, %v4423_v6  ;;  %v4315_v28 = vld [vmem:[%s5084_s2 + $0x8] sm:$0xff]  }
  0x1b   : > { %636 = vmatpush1.bf16.msra.mxu0 %v494_v29  ;;  %571 = vmatprep.mubr.bf16.mxu0 %v4348_v3  ;;  %v982_v62 = vcombine.high %v974_v59, %v974_v59  ;;  %v983_v63 = vcombine.high %v981_v61, %v981_v61  ;;  %v1046_v13 = vand.u32 %v4504_v45, %v974_v59 }
  0x1c   : > { %4135 = vmatmul.mubr.msk.bf16.vlgmr.msra.gmra.mrb[0].mxu1 %vm473_vm1, %v4447_v25  ;;  %4143 = vmatprep.subr.msk.bf16.mxu0 %vm480_vm0, %v454_v30  ;;  %v998_v10 = vrot.slane %v984_v8, %v4423_v6  ;;  %v999_v11 = vcombine.high %v991_v9, %v991_v9  ;;  %v1052_v15 = vand.u32 %v4504_v45, %v981_v61 }
  0x1d   : > { %689 = vmatpush1.bf16.msra.mxu1 %v500_v31  ;;  %624 = vmatprep.mubr.bf16.mxu1 %v4348_v3  ;;  %v1049_v2 = vand.u32 %v4504_v45, %v982_v62  ;;  %v1055_v5 = vand.u32 %v4504_v45, %v983_v63  ;;  %v1001_v18 = vcombine.high %v381_v17, %v381_v17 }
  0x1e   : > { %4146 = vmatprep.subr.msk.bf16.mxu1 %vm480_vm0, %v455_v32  ;;  %1749 = vperm.xlu0 %4305, %v1683_v56   ;;  %v1000_v12 = vcombine.high %v998_v10, %v998_v10  ;;  %v1061_v14 = vand.u32 %v4504_v45, %v999_v11  ;;  %v1008_v19 = vrot.slane %v381_v17, %v4423_v6 }
  0x1f   : > { %1744 = vperm.xlu1 %4306, %v1682_v57   ;;  %v1015_v20 = vrot.slane %v1001_v18, %v4423_v6  ;;  %v1058_v24 = vand.u32 %v4504_v45, %v991_v9  ;;  %v1064_v26 = vand.u32 %v4504_v45, %v998_v10  ;;  %v1025_v29 = vrot.slane %v4474_v33, %v4423_v6 }
  0x20   : > { %v1067_v16 = vand.u32 %v4504_v45, %v1000_v12  ;;  %v1016_v21 = vcombine.high %v1008_v19, %v1008_v19  ;;  %v1034_v31 = vcombine.high %v4496_v42, %v4496_v42  ;;  %v1070_v32 = vand.u32 %v4504_v45, %v1008_v19 }
  0x21   : > { %v1017_v23 = vcombine.high %v1015_v20, %v1015_v20  ;;  %v1033_v30 = vcombine.high %v1025_v29, %v1025_v29  ;;  %v1076_v35 = vand.u32 %v4504_v45, %v1015_v20  ;;  %v1082_v33 = vand.u32 %v4504_v45, %v1025_v29 }
  0x22   : > { %4133 = vmatmul.mubr.msk.bf16.gmra.mrb[4].mxu0 %vm473_vm1, %v4486_v36  ;;  %v1091_v6 = vand.u32 %v4504_v45, %v1034_v31 }
  0x23   : > { %667 = vmatprep.mubr.bf16.mxu0 %v4348_v3  ;;  %1754 = vperm.xlu1 %4306, %v1684_v60   ;;  %v1079_v27 = vand.u32 %v4504_v45, %v1017_v23  ;;  %v1085_v34 = vand.u32 %v4504_v45, %v1033_v30 }
  0x24   : > { %4136 = vmatmul.mubr.msk.bf16.gmra.mrb[4].mxu1 %vm473_vm1, %v4486_v36 }
  0x25   : > { %720 = vmatprep.mubr.bf16.mxu1 %v4348_v3 }
  0x2a   : > { %4138 = vmatmul.mubr.msk.bf16.vlgmr.msra.gmra.mrb[8].mxu0 %vm473_vm1, %v4447_v25 }
  0x2b   : > { %742 = vmatpush1.bf16.msra.mxu0 %v506_v51  ;;  %677 = vmatprep.mubr.bf16.mxu0 %v4348_v3 }
  0x2c   : > { %4141 = vmatmul.mubr.msk.bf16.vlgmr.msra.gmra.mrb[8].mxu1 %vm473_vm1, %v4447_v25  ;;  %4149 = vmatprep.subr.msk.bf16.mxu0 %vm480_vm0, %v471_v52 }
  0x2d   : > { %795 = vmatpush1.bf16.msra.mxu1 %v512_v53  ;;  %730 = vmatprep.mubr.bf16.mxu1 %v4348_v3 }
  0x2e   : > { %4152 = vmatprep.subr.msk.bf16.mxu1 %vm480_vm0, %v472_v54 }
  0x32   : > { %4139 = vmatmul.mubr.msk.bf16.gmra.mrb[12].mxu0 %vm473_vm1, %v4486_v36 }
  0x33   : > { %773 = vmatprep.mubr.bf16.mxu0 %v4348_v3 }
  0x34   : > { %4142 = vmatmul.mubr.msk.bf16.gmra.mrb[12].mxu1 %vm473_vm1, %v4486_v36 }
  0x35   : > { %826 = vmatprep.mubr.bf16.mxu1 %v4348_v3 }
  0x3a   : > { %4144 = vmatmul.mubr.msk.bf16.vlgmr.msra.gmra.mrb[16].mxu0 %vm473_vm1, %v4447_v25 }
  0x3b   : > { %848 = vmatpush1.bf16.msra.mxu0 %v518_v1  ;;  %783 = vmatprep.mubr.bf16.mxu0 %v4348_v3 }
  0x3c   : > { %4147 = vmatmul.mubr.msk.bf16.vlgmr.msra.gmra.mrb[16].mxu1 %vm473_vm1, %v4447_v25  ;;  %1093 = vmatprep.subr.bf16.mxu0 %v1049_v2 }
  0x3d   : > { %901 = vmatpush1.bf16.msra.mxu1 %v524_v4  ;;  %836 = vmatprep.mubr.bf16.mxu1 %v4348_v3 }
  0x3e   : > { %1146 = vmatprep.subr.bf16.mxu1 %v1055_v5 }
  0x42   : > { %4145 = vmatmul.mubr.msk.bf16.gmra.mrb[20].mxu0 %vm473_vm1, %v4486_v36 }
  0x43   : > { %879 = vmatprep.mubr.bf16.mxu0 %v4348_v3 }
  0x44   : > { %4148 = vmatmul.mubr.msk.bf16.gmra.mrb[20].mxu1 %vm473_vm1, %v4486_v36 }
  0x45   : > { %932 = vmatprep.mubr.bf16.mxu1 %v4348_v3 }
  0x4a   : > { %4150 = vmatmul.mubr.msk.bf16.vlgmr.msra.gmra.mrb[24].mxu0 %vm473_vm1, %v4447_v25 }
  0x4b   : > { %1094 = vmatpush1.bf16.msra.mxu0 %v1046_v13  ;;  %889 = vmatprep.mubr.bf16.mxu0 %v4348_v3 }
  0x4c   : > { %4153 = vmatmul.mubr.msk.bf16.vlgmr.msra.gmra.mrb[24].mxu1 %vm473_vm1, %v4447_v25  ;;  %1199 = vmatprep.subr.bf16.mxu0 %v1061_v14  ;;  %v1073_v25 = vand.u32 %v4504_v45, %v1016_v21 }
  0x4d   : > { %1147 = vmatpush1.bf16.msra.mxu1 %v1052_v15  ;;  %942 = vmatprep.mubr.bf16.mxu1 %v4348_v3 }
  0x4e   : > { %1252 = vmatprep.subr.bf16.mxu1 %v1067_v16 }
  0x52   : > { %4151 = vmatmul.mubr.msk.bf16.gmra.mrb[28].mxu0 %vm473_vm1, %v4486_v36 }
  0x53   : > { %1125 = vmatprep.mubr.bf16.mxu0 %v4348_v3 }
  0x54   : > { %4154 = vmatmul.mubr.msk.bf16.gmra.mrb[28].mxu1 %vm473_vm1, %v4486_v36 }
  0x55   : > { %1178 = vmatprep.mubr.bf16.mxu1 %v4348_v3 }
  0x5a   : > { %4157 = vmatmul.mubr.msk.bf16.vlgmr.msra.gmra.mrb[0].mxu0 %vm1035_vm3, %v4314_v22 }
  0x5b   : > { %1135 = vmatprep.mubr.bf16.mxu0 %v4348_v3  ;;  %1200 = vmatpush1.bf16.msra.mxu0 %v1058_v24 }
  0x5c   : > { %4159 = vmatmul.mubr.msk.bf16.vlgmr.msra.gmra.mrb[0].mxu1 %vm1035_vm3, %v4314_v22  ;;  %1305 = vmatprep.subr.bf16.mxu0 %v1073_v25 }
  0x5d   : > { %1188 = vmatprep.mubr.bf16.mxu1 %v4348_v3  ;;  %1253 = vmatpush1.bf16.msra.mxu1 %v1064_v26 }
  0x5e   : > { %1358 = vmatprep.subr.bf16.mxu1 %v1079_v27 }
  0x62   : > { %4158 = vmatmul.mubr.msk.bf16.gmra.mrb[4].mxu0 %vm1035_vm3, %v4315_v28 }
  0x63   : > { %1231 = vmatprep.mubr.bf16.mxu0 %v4348_v3 }
  0x64   : > { %4160 = vmatmul.mubr.msk.bf16.gmra.mrb[4].mxu1 %vm1035_vm3, %v4315_v28 }
  0x65   : > { %1284 = vmatprep.mubr.bf16.mxu1 %v4348_v3 }
  0x6a   : > { %4161 = vmatmul.mubr.msk.bf16.vlgmr.msra.gmra.mrb[8].mxu0 %vm1035_vm3, %v4314_v22 }
  0x6b   : > { %1241 = vmatprep.mubr.bf16.mxu0 %v4348_v3  ;;  %1306 = vmatpush1.bf16.msra.mxu0 %v1070_v32 }
  0x6c   : > { %4163 = vmatmul.mubr.msk.bf16.vlgmr.msra.gmra.mrb[8].mxu1 %vm1035_vm3, %v4314_v22  ;;  %1411 = vmatprep.subr.bf16.mxu0 %v1085_v34 }
  0x6d   : > { %1294 = vmatprep.mubr.bf16.mxu1 %v4348_v3  ;;  %1359 = vmatpush1.bf16.msra.mxu1 %v1076_v35 }
  0x6e   : > { %1464 = vmatprep.subr.bf16.mxu1 %v1091_v6 }
  0x72   : > { %4162 = vmatmul.mubr.msk.bf16.gmra.mrb[12].mxu0 %vm1035_vm3, %v4315_v28 }
  0x73   : > { %1337 = vmatprep.mubr.bf16.mxu0 %v4348_v3 }
  0x74   : > { %4164 = vmatmul.mubr.msk.bf16.gmra.mrb[12].mxu1 %vm1035_vm3, %v4315_v28 }
  0x75   : > { %1390 = vmatprep.mubr.bf16.mxu1 %v4348_v3 }
  0x7a   : > { %4165 = vmatmul.mubr.msk.bf16.vlgmr.msra.gmra.mrb[16].mxu0 %vm1035_vm3, %v4314_v22 }
  0x7b   : > { %1347 = vmatprep.mubr.bf16.mxu0 %v4348_v3  ;;  %1412 = vmatpush1.bf16.msra.mxu0 %v1082_v33 }
  0x7c   : > { %4167 = vmatmul.mubr.msk.bf16.vlgmr.msra.gmra.mrb[16].mxu1 %vm1035_vm3, %v4314_v22 }
  0x7d   : > { %1400 = vmatprep.mubr.bf16.mxu1 %v4348_v3  ;;  %1465 = vmatpush1.bf16.msra.mxu1 %v1088_v46 }
  0x82   : > { %4166 = vmatmul.mubr.msk.bf16.gmra.mrb[20].mxu0 %vm1035_vm3, %v4315_v28 }
  0x83   : > { %1443 = vmatprep.mubr.bf16.mxu0 %v4348_v3 }
  0x84   : > { %4168 = vmatmul.mubr.msk.bf16.gmra.mrb[20].mxu1 %vm1035_vm3, %v4315_v28 }
  0x85   : > { %1496 = vmatprep.mubr.bf16.mxu1 %v4348_v3 }
  0x88   : > { %v4641_v36 = vpop.permute.xlu0 %1523  ;;  %v4643_v37 = vpop.permute.xlu1 %1533 }
  0x8a   : > { %4169 = vmatmul.mubr.msk.bf16.vlgmr.msra.gmra.mrb[24].mxu0 %vm1035_vm3, %v4314_v22 }
  0x8b   : > { %1453 = vmatprep.mubr.bf16.mxu0 %v4348_v3 }
  0x8c   : > { %4171 = vmatmul.mubr.msk.bf16.vlgmr.msra.gmra.mrb[24].mxu1 %vm1035_vm3, %v4314_v22  ;;  %v4645_v39 = vpop.permute.xlu0 %1528  ;;  %v4655_v4 = vpop.permute.xlu1 %1538 }
  0x8d   : > { %1506 = vmatprep.mubr.bf16.mxu1 %v4348_v3 }
  0x92   : > { %4170 = vmatmul.mubr.msk.bf16.gmra.mrb[28].mxu0 %vm1035_vm3, %v4315_v28 }
  0x93   : > { %1822 = vmatprep.mubr.bf16.mxu0 %v4348_v3 }
  0x94   : > { %4172 = vmatmul.mubr.msk.bf16.gmra.mrb[28].mxu1 %vm1035_vm3, %v4315_v28 }
  0x95   : > { %1895 = vmatprep.mubr.bf16.mxu1 %v4348_v3 }
 0x12d   : > { %v1127_v38 = vpop.f32.mrb[0].mxu0 }
 0x12e   : > { %v1541_v40 = vadd.f32 %v4641_v36, %v1127_v38  ;;  %v1129_v41 = vpop.f32.mrb[1].mxu0 }
 0x12f   : > { %v1542_v42 = vadd.f32 %v4641_v36, %v1129_v41  ;;  %v1131_v43 = vpop.f32.mrb[2].mxu0  ;;  %v1180_v44 = vpop.f32.mrb[0].mxu1 }
 0x130   : > { %v1557_v45 = vadd.f32 %v4645_v39, %v1131_v43  ;;  %v1543_v46 = vadd.f32 %v4641_v36, %v1180_v44  ;;  %v1133_v47 = vpop.f32.mrb[3].mxu0  ;;  %v1182_v48 = vpop.f32.mrb[1].mxu1  ;;  %v1605_v52 = vmax.f32 %v1541_v40, 0.0  ;;  %v4670_v43 = vld [vmem:[%s5087_s5] sm:$0xff]  }
 0x131   : > { %v1558_v49 = vadd.f32 %v4645_v39, %v1133_v47  ;;  %v1544_v50 = vadd.f32 %v4641_v36, %v1182_v48  ;;  %v1184_v51 = vpop.f32.mrb[2].mxu1  ;;  %v1606_v56 = vmax.f32 %v1542_v42, 0.0 }
 0x132   : > { %v1621_v53 = vmax.f32 %v1557_v45, 0.0  ;;  %v1559_v54 = vadd.f32 %v4645_v39, %v1184_v51  ;;  %v1186_v55 = vpop.f32.mrb[3].mxu1  ;;  %v1607_v60 = vmax.f32 %v1543_v46, 0.0 }
 0x133   : > { %v1622_v57 = vmax.f32 %v1558_v49, 0.0  ;;  %v1560_v58 = vadd.f32 %v4645_v39, %v1186_v55  ;;  %v1608_v63 = vmax.f32 %v1544_v50, 0.0 }
 0x134   : > { %v1685_v59 = vpack.c.bf16 %v1621_v53, %v1605_v52  ;;  %v1623_v61 = vmax.f32 %v1559_v54, 0.0 }
 0x135   : > { %v1686_v62 = vpack.c.bf16 %v1622_v57, %v1606_v56  ;;  %v1624_v1 = vmax.f32 %v1560_v58, 0.0  ;;  %v1137_v2 = vpop.f32.mrb[4].mxu0 }
 0x136   : > { %v1687_v5 = vpack.c.bf16 %v1623_v61, %v1607_v60  ;;  %v1573_v7 = vadd.f32 %v4643_v37, %v1137_v2  ;;  %v1139_v8 = vpop.f32.mrb[5].mxu0 }
 0x137   : > { %v1688_v9 = vpack.c.bf16 %v1624_v1, %v1608_v63  ;;  %v1574_v10 = vadd.f32 %v4643_v37, %v1139_v8  ;;  %v1141_v11 = vpop.f32.mrb[6].mxu0  ;;  %v1190_v12 = vpop.f32.mrb[4].mxu1  ;;  %1790 = vmatprep.subr.bf16.mxu0 %v1686_v62 }
 0x138   : > { %v1589_v13 = vadd.f32 %v4655_v4, %v1141_v11  ;;  %v1575_v14 = vadd.f32 %v4643_v37, %v1190_v12  ;;  %v1143_v15 = vpop.f32.mrb[7].mxu0  ;;  %v1192_v16 = vpop.f32.mrb[5].mxu1  ;;  %1791 = vmatpush1.bf16.msra.mxu0 %v1685_v59  ;;  %v1637_v20 = vmax.f32 %v1573_v7, 0.0  ;;  %v4689_v12 = vld [vmem:[%s5087_s5 + $0x8] sm:$0xff]  }
 0x139   : > { %v1590_v17 = vadd.f32 %v4655_v4, %v1143_v15  ;;  %v1576_v18 = vadd.f32 %v4643_v37, %v1192_v16  ;;  %v1194_v19 = vpop.f32.mrb[6].mxu1  ;;  %1863 = vmatprep.subr.bf16.mxu1 %v1688_v9  ;;  %v1638_v24 = vmax.f32 %v1574_v10, 0.0 }
 0x13a   : > { %v1653_v21 = vmax.f32 %v1589_v13, 0.0  ;;  %v1591_v22 = vadd.f32 %v4655_v4, %v1194_v19  ;;  %v1196_v23 = vpop.f32.mrb[7].mxu1  ;;  %1864 = vmatpush1.bf16.msra.mxu1 %v1687_v5  ;;  %v1639_v28 = vmax.f32 %v1575_v14, 0.0 }
 0x13b   : > { %v1654_v25 = vmax.f32 %v1590_v17, 0.0  ;;  %v1592_v26 = vadd.f32 %v4655_v4, %v1196_v23  ;;  %v1640_v31 = vmax.f32 %v1576_v18, 0.0 }
 0x13c   : > { %v1701_v27 = vpack.c.bf16 %v1653_v21, %v1637_v20  ;;  %v1655_v29 = vmax.f32 %v1591_v22, 0.0 }
 0x13d   : > { %v1702_v30 = vpack.c.bf16 %v1654_v25, %v1638_v24  ;;  %v1656_v32 = vmax.f32 %v1592_v26, 0.0  ;;  %v1233_v34 = vpop.f32.mrb[8].mxu0 }
 0x13e   : > { %v1703_v35 = vpack.c.bf16 %v1655_v29, %v1639_v28  ;;  %v1545_v6 = vadd.f32 %v4641_v36, %v1233_v34  ;;  %v1235_v33 = vpop.f32.mrb[9].mxu0 }
 0x13f   : > { %v1704_v38 = vpack.c.bf16 %v1656_v32, %v1640_v31  ;;  %v1546_v40 = vadd.f32 %v4641_v36, %v1235_v33  ;;  %v1237_v41 = vpop.f32.mrb[10].mxu0  ;;  %v1286_v42 = vpop.f32.mrb[8].mxu1  ;;  %1792 = vmatprep.subr.bf16.mxu0 %v1702_v30 }
 0x140   : > { %v1561_v44 = vadd.f32 %v4645_v39, %v1237_v41  ;;  %v1547_v45 = vadd.f32 %v4641_v36, %v1286_v42  ;;  %v1239_v46 = vpop.f32.mrb[11].mxu0  ;;  %v1288_v47 = vpop.f32.mrb[9].mxu1  ;;  %1793 = vmatpush1.bf16.msra.mxu0 %v1701_v27  ;;  %v1609_v51 = vmax.f32 %v1545_v6, 0.0 }
 0x141   : > { %v1562_v48 = vadd.f32 %v4645_v39, %v1239_v46  ;;  %v1548_v49 = vadd.f32 %v4641_v36, %v1288_v47  ;;  %v1290_v50 = vpop.f32.mrb[10].mxu1  ;;  %1865 = vmatprep.subr.bf16.mxu1 %v1704_v38  ;;  %v1610_v55 = vmax.f32 %v1546_v40, 0.0 }
 0x142   : > { %v1625_v52 = vmax.f32 %v1561_v44, 0.0  ;;  %v1563_v53 = vadd.f32 %v4645_v39, %v1290_v50  ;;  %v1292_v54 = vpop.f32.mrb[11].mxu1  ;;  %1866 = vmatpush1.bf16.msra.mxu1 %v1703_v35  ;;  %v1611_v59 = vmax.f32 %v1547_v45, 0.0  ;;  %v4708_v44 = vld [vmem:[%s5087_s5 + $0x10] sm:$0xff]  }
 0x143   : > { %v1626_v56 = vmax.f32 %v1562_v48, 0.0  ;;  %v1564_v57 = vadd.f32 %v4645_v39, %v1292_v54  ;;  %4177 = vmatmul.mubr.msk.bf16.vlgmr.msra.gmra.mrb[32].mxu0 %vm1777_vm4, %v4670_v43  ;;  %v1612_v62 = vmax.f32 %v1548_v49, 0.0 }
 0x144   : > { %v1689_v58 = vpack.c.bf16 %v1625_v52, %v1609_v51  ;;  %v1627_v60 = vmax.f32 %v1563_v53, 0.0  ;;  %1832 = vmatprep.mubr.bf16.mxu0 %v4348_v3 }
 0x145   : > { %v1690_v61 = vpack.c.bf16 %v1626_v56, %v1610_v55  ;;  %v1628_v63 = vmax.f32 %v1564_v57, 0.0  ;;  %v1243_v1 = vpop.f32.mrb[12].mxu0  ;;  %4181 = vmatmul.mubr.msk.bf16.vlgmr.msra.gmra.mrb[32].mxu1 %vm1777_vm4, %v4670_v43 }
 0x146   : > { %v1691_v2 = vpack.c.bf16 %v1627_v60, %v1611_v59  ;;  %v1577_v5 = vadd.f32 %v4643_v37, %v1243_v1  ;;  %v1245_v7 = vpop.f32.mrb[13].mxu0  ;;  %1905 = vmatprep.mubr.bf16.mxu1 %v4348_v3 }
 0x147   : > { %v1692_v8 = vpack.c.bf16 %v1628_v63, %v1612_v62  ;;  %v1578_v9 = vadd.f32 %v4643_v37, %v1245_v7  ;;  %v1247_v10 = vpop.f32.mrb[14].mxu0  ;;  %v1296_v11 = vpop.f32.mrb[12].mxu1  ;;  %1936 = vmatprep.subr.bf16.mxu0 %v1690_v61 }
 0x148   : > { %v1593_v13 = vadd.f32 %v4655_v4, %v1247_v10  ;;  %v1579_v14 = vadd.f32 %v4643_v37, %v1296_v11  ;;  %v1249_v15 = vpop.f32.mrb[15].mxu0  ;;  %v1298_v16 = vpop.f32.mrb[13].mxu1  ;;  %1937 = vmatpush1.bf16.msra.mxu0 %v1689_v58  ;;  %v1641_v20 = vmax.f32 %v1577_v5, 0.0 }
 0x149   : > { %v1594_v17 = vadd.f32 %v4655_v4, %v1249_v15  ;;  %v1580_v18 = vadd.f32 %v4643_v37, %v1298_v16  ;;  %v1300_v19 = vpop.f32.mrb[14].mxu1  ;;  %2009 = vmatprep.subr.bf16.mxu1 %v1692_v8  ;;  %v1642_v24 = vmax.f32 %v1578_v9, 0.0 }
 0x14a   : > { %v1657_v21 = vmax.f32 %v1593_v13, 0.0  ;;  %v1595_v22 = vadd.f32 %v4655_v4, %v1300_v19  ;;  %v1302_v23 = vpop.f32.mrb[15].mxu1  ;;  %2010 = vmatpush1.bf16.msra.mxu1 %v1691_v2  ;;  %v1643_v28 = vmax.f32 %v1579_v14, 0.0  ;;  %v4731_v14 = vld [vmem:[%s5087_s5 + $0x18] sm:$0xff]  }
 0x14b   : > { %v1658_v25 = vmax.f32 %v1594_v17, 0.0  ;;  %v1596_v26 = vadd.f32 %v4655_v4, %v1302_v23  ;;  %4178 = vmatmul.mubr.msk.bf16.gmra.mrb[36].mxu0 %vm1777_vm4, %v4689_v12  ;;  %v1644_v31 = vmax.f32 %v1580_v18, 0.0 }
 0x14c   : > { %v1705_v27 = vpack.c.bf16 %v1657_v21, %v1641_v20  ;;  %v1659_v29 = vmax.f32 %v1595_v22, 0.0  ;;  %1842 = vmatprep.mubr.bf16.mxu0 %v4348_v3 }
 0x14d   : > { %v1706_v30 = vpack.c.bf16 %v1658_v25, %v1642_v24  ;;  %v1660_v32 = vmax.f32 %v1596_v26, 0.0  ;;  %v1339_v34 = vpop.f32.mrb[16].mxu0  ;;  %4182 = vmatmul.mubr.msk.bf16.gmra.mrb[36].mxu1 %vm1777_vm4, %v4689_v12 }
 0x14e   : > { %v1707_v35 = vpack.c.bf16 %v1659_v29, %v1643_v28  ;;  %v1549_v6 = vadd.f32 %v4641_v36, %v1339_v34  ;;  %v1341_v33 = vpop.f32.mrb[17].mxu0  ;;  %1915 = vmatprep.mubr.bf16.mxu1 %v4348_v3 }
 0x14f   : > { %v1708_v38 = vpack.c.bf16 %v1660_v32, %v1644_v31  ;;  %v1550_v40 = vadd.f32 %v4641_v36, %v1341_v33  ;;  %v1343_v41 = vpop.f32.mrb[18].mxu0  ;;  %v1392_v42 = vpop.f32.mrb[16].mxu1  ;;  %1938 = vmatprep.subr.bf16.mxu0 %v1706_v30 }
 0x150   : > { %v1565_v45 = vadd.f32 %v4645_v39, %v1343_v41  ;;  %v1551_v46 = vadd.f32 %v4641_v36, %v1392_v42  ;;  %v1345_v47 = vpop.f32.mrb[19].mxu0  ;;  %v1394_v48 = vpop.f32.mrb[17].mxu1  ;;  %1939 = vmatpush1.bf16.msra.mxu0 %v1705_v27  ;;  %v1613_v52 = vmax.f32 %v1549_v6, 0.0 }
 0x151   : > { %v1566_v49 = vadd.f32 %v4645_v39, %v1345_v47  ;;  %v1552_v50 = vadd.f32 %v4641_v36, %v1394_v48  ;;  %v1396_v51 = vpop.f32.mrb[18].mxu1  ;;  %2011 = vmatprep.subr.bf16.mxu1 %v1708_v38  ;;  %v1614_v56 = vmax.f32 %v1550_v40, 0.0 }
 0x152   : > { %v1629_v53 = vmax.f32 %v1565_v45, 0.0  ;;  %v1567_v54 = vadd.f32 %v4645_v39, %v1396_v51  ;;  %v1398_v55 = vpop.f32.mrb[19].mxu1  ;;  %2012 = vmatpush1.bf16.msra.mxu1 %v1707_v35  ;;  %v1615_v60 = vmax.f32 %v1551_v46, 0.0 }
 0x153   : > { %v1630_v57 = vmax.f32 %v1566_v49, 0.0  ;;  %v1568_v58 = vadd.f32 %v4645_v39, %v1398_v55  ;;  %4179 = vmatmul.mubr.msk.bf16.gmra.mrb[40].mxu0 %vm1777_vm4, %v4708_v44  ;;  %v1616_v63 = vmax.f32 %v1552_v50, 0.0 }
 0x154   : > { %v4718_v59 = vpack.c.bf16 %v1629_v53, %v1613_v52  ;;  %v1631_v61 = vmax.f32 %v1567_v54, 0.0  ;;  %1852 = vmatprep.mubr.bf16.mxu0 %v4348_v3 }
 0x155   : > { %v1694_v62 = vpack.c.bf16 %v1630_v57, %v1614_v56  ;;  %v1632_v1 = vmax.f32 %v1568_v58, 0.0  ;;  %v1349_v2 = vpop.f32.mrb[20].mxu0  ;;  %4183 = vmatmul.mubr.msk.bf16.gmra.mrb[40].mxu1 %vm1777_vm4, %v4708_v44 }
 0x156   : > { %v4723_v5 = vpack.c.bf16 %v1631_v61, %v1615_v60  ;;  %v1581_v7 = vadd.f32 %v4643_v37, %v1349_v2  ;;  %v1351_v8 = vpop.f32.mrb[21].mxu0  ;;  %1925 = vmatprep.mubr.bf16.mxu1 %v4348_v3 }
 0x157   : > { %v1696_v9 = vpack.c.bf16 %v1632_v1, %v1616_v63  ;;  %v1582_v10 = vadd.f32 %v4643_v37, %v1351_v8  ;;  %v1353_v11 = vpop.f32.mrb[22].mxu0  ;;  %v1402_v13 = vpop.f32.mrb[20].mxu1  ;;  %2082 = vmatprep.subr.bf16.mxu0 %v1694_v62 }
 0x158   : > { %v1597_v15 = vadd.f32 %v4655_v4, %v1353_v11  ;;  %v1583_v16 = vadd.f32 %v4643_v37, %v1402_v13  ;;  %v1355_v17 = vpop.f32.mrb[23].mxu0  ;;  %v1404_v18 = vpop.f32.mrb[21].mxu1  ;;  %v1645_v22 = vmax.f32 %v1581_v7, 0.0 }
 0x159   : > { %v1598_v19 = vadd.f32 %v4655_v4, %v1355_v17  ;;  %v1584_v20 = vadd.f32 %v4643_v37, %v1404_v18  ;;  %v1406_v21 = vpop.f32.mrb[22].mxu1  ;;  %2155 = vmatprep.subr.bf16.mxu1 %v1696_v9  ;;  %v1646_v26 = vmax.f32 %v1582_v10, 0.0 }
 0x15a   : > { %v1661_v23 = vmax.f32 %v1597_v15, 0.0  ;;  %v1599_v24 = vadd.f32 %v4655_v4, %v1406_v21  ;;  %v1408_v25 = vpop.f32.mrb[23].mxu1  ;;  %v1647_v30 = vmax.f32 %v1583_v16, 0.0 }
 0x15b   : > { %v1662_v27 = vmax.f32 %v1598_v19, 0.0  ;;  %v1600_v28 = vadd.f32 %v4655_v4, %v1408_v25  ;;  %4180 = vmatmul.mubr.msk.bf16.gmra.mrb[44].mxu0 %vm1777_vm4, %v4731_v14  ;;  %v1648_v34 = vmax.f32 %v1584_v20, 0.0 }
 0x15c   : > { %v1709_v29 = vpack.c.bf16 %v1661_v23, %v1645_v22  ;;  %v1663_v31 = vmax.f32 %v1599_v24, 0.0  ;;  %1968 = vmatprep.mubr.bf16.mxu0 %v4348_v3 }
 0x15d   : > { %v1710_v32 = vpack.c.bf16 %v1662_v27, %v1646_v26  ;;  %v1664_v35 = vmax.f32 %v1600_v28, 0.0  ;;  %v1445_v6 = vpop.f32.mrb[24].mxu0  ;;  %4184 = vmatmul.mubr.msk.bf16.gmra.mrb[44].mxu1 %vm1777_vm4, %v4731_v14 }
 0x15e   : > { %v1711_v33 = vpack.c.bf16 %v1663_v31, %v1647_v30  ;;  %v1553_v38 = vadd.f32 %v4641_v36, %v1445_v6  ;;  %v1447_v40 = vpop.f32.mrb[25].mxu0  ;;  %2041 = vmatprep.mubr.bf16.mxu1 %v4348_v3 }
 0x15f   : > { %v1712_v41 = vpack.c.bf16 %v1664_v35, %v1648_v34  ;;  %v1554_v42 = vadd.f32 %v4641_v36, %v1447_v40  ;;  %v1449_v45 = vpop.f32.mrb[26].mxu0  ;;  %v1498_v46 = vpop.f32.mrb[24].mxu1 }
 0x160   : > { %v1569_v47 = vadd.f32 %v4645_v39, %v1449_v45  ;;  %v1555_v48 = vadd.f32 %v4641_v36, %v1498_v46  ;;  %v1451_v49 = vpop.f32.mrb[27].mxu0  ;;  %v1500_v50 = vpop.f32.mrb[25].mxu1  ;;  %v1617_v54 = vmax.f32 %v1553_v38, 0.0 }
 0x161   : > { %v1570_v51 = vadd.f32 %v4645_v39, %v1451_v49  ;;  %v1556_v52 = vadd.f32 %v4641_v36, %v1500_v50  ;;  %v1502_v53 = vpop.f32.mrb[26].mxu1  ;;  %v1618_v58 = vmax.f32 %v1554_v42, 0.0 }
 0x162   : > { %v1633_v55 = vmax.f32 %v1569_v47, 0.0  ;;  %v1571_v56 = vadd.f32 %v4645_v39, %v1502_v53  ;;  %v1504_v57 = vpop.f32.mrb[27].mxu1  ;;  %v1619_v63 = vmax.f32 %v1555_v48, 0.0 }
 0x163   : > { %v1634_v60 = vmax.f32 %v1570_v51, 0.0  ;;  %v1572_v61 = vadd.f32 %v4645_v39, %v1504_v57  ;;  %4185 = vmatmul.mubr.msk.bf16.vlgmr.msra.gmra.mrb[48].mxu0 %vm1777_vm4, %v4670_v43  ;;  %v1620_v2 = vmax.f32 %v1556_v52, 0.0 }
 0x164   : > { %v1697_v62 = vpack.c.bf16 %v1633_v55, %v1617_v54  ;;  %v1635_v1 = vmax.f32 %v1571_v56, 0.0  ;;  %2083 = vmatpush1.bf16.msra.mxu0 %v4718_v59  ;;  %1978 = vmatprep.mubr.bf16.mxu0 %v4348_v3 }
 0x165   : > { %v1698_v36 = vpack.c.bf16 %v1634_v60, %v1618_v58  ;;  %v1636_v7 = vmax.f32 %v1572_v61, 0.0  ;;  %2084 = vmatprep.subr.bf16.mxu0 %v1710_v32  ;;  %v1455_v8 = vpop.f32.mrb[28].mxu0  ;;  %4189 = vmatmul.mubr.msk.bf16.vlgmr.msra.gmra.mrb[48].mxu1 %vm1777_vm4, %v4670_v43 }
 0x166   : > { %v1699_v9 = vpack.c.bf16 %v1635_v1, %v1619_v63  ;;  %v1585_v39 = vadd.f32 %v4643_v37, %v1455_v8  ;;  %2156 = vmatpush1.bf16.msra.mxu1 %v4723_v5  ;;  %v1457_v10 = vpop.f32.mrb[29].mxu0  ;;  %2051 = vmatprep.mubr.bf16.mxu1 %v4348_v3 }
 0x167   : > { %v1700_v11 = vpack.c.bf16 %v1636_v7, %v1620_v2  ;;  %v1586_v59 = vadd.f32 %v4643_v37, %v1457_v10  ;;  %2157 = vmatprep.subr.bf16.mxu1 %v1712_v41  ;;  %v1459_v13 = vpop.f32.mrb[30].mxu0  ;;  %v1508_v15 = vpop.f32.mrb[28].mxu1 }
 0x168   : > { %v1601_v16 = vadd.f32 %v4655_v4, %v1459_v13  ;;  %v1587_v17 = vadd.f32 %v4643_v37, %v1508_v15  ;;  %2085 = vmatpush1.bf16.msra.mxu0 %v1709_v29  ;;  %v1461_v18 = vpop.f32.mrb[31].mxu0  ;;  %v1510_v19 = vpop.f32.mrb[29].mxu1  ;;  %v1649_v22 = vmax.f32 %v1585_v39, 0.0 }
 0x169   : > { %v1602_v20 = vadd.f32 %v4655_v4, %v1461_v18  ;;  %v1588_v5 = vadd.f32 %v4643_v37, %v1510_v19  ;;  %2228 = vmatprep.subr.bf16.mxu0 %v1698_v36  ;;  %v1512_v21 = vpop.f32.mrb[30].mxu1  ;;  %v1650_v26 = vmax.f32 %v1586_v59, 0.0 }
 0x16a   : > { %v1665_v23 = vmax.f32 %v1601_v16, 0.0  ;;  %v1603_v24 = vadd.f32 %v4655_v4, %v1512_v21  ;;  %2158 = vmatpush1.bf16.msra.mxu1 %v1711_v33  ;;  %v1514_v25 = vpop.f32.mrb[31].mxu1  ;;  %v1651_v30 = vmax.f32 %v1587_v17, 0.0 }
 0x16b   : > { %v1666_v27 = vmax.f32 %v1602_v20, 0.0  ;;  %v1604_v28 = vadd.f32 %v4655_v4, %v1514_v25  ;;  %2301 = vmatprep.subr.bf16.mxu1 %v1700_v11  ;;  %4186 = vmatmul.mubr.msk.bf16.gmra.mrb[52].mxu0 %vm1777_vm4, %v4689_v12  ;;  %v1652_v32 = vmax.f32 %v1588_v5, 0.0  ;;  %v4833_v4 = vpop.permute.xlu0 %1719 }
 0x16c   : > { %v1713_v29 = vpack.c.bf16 %v1665_v23, %v1649_v22  ;;  %v1667_v31 = vmax.f32 %v1603_v24, 0.0  ;;  %1988 = vmatprep.mubr.bf16.mxu0 %v4348_v3 }
 0x16d   : > { %v1714_v37 = vpack.c.bf16 %v1666_v27, %v1650_v26  ;;  %v1668_v34 = vmax.f32 %v1604_v28, 0.0  ;;  %4190 = vmatmul.mubr.msk.bf16.gmra.mrb[52].mxu1 %vm1777_vm4, %v4689_v12 }
 0x16e   : > { %v1715_v35 = vpack.c.bf16 %v1667_v31, %v1651_v30  ;;  %2061 = vmatprep.mubr.bf16.mxu1 %v4348_v3 }
 0x16f   : > { %v1716_v6 = vpack.c.bf16 %v1668_v34, %v1652_v32  ;;  %v4845_v60 = vpop.permute.xlu0 %1729 }
 0x173   : > { %4187 = vmatmul.mubr.msk.bf16.gmra.mrb[56].mxu0 %vm1777_vm4, %v4708_v44  ;;  %v4861_v31 = vpop.permute.xlu0 %1739 }
 0x174   : > { %1998 = vmatprep.mubr.bf16.mxu0 %v4348_v3 }
 0x175   : > { %4191 = vmatmul.mubr.msk.bf16.gmra.mrb[56].mxu1 %vm1777_vm4, %v4708_v44 }
 0x176   : > { %2071 = vmatprep.mubr.bf16.mxu1 %v4348_v3 }
 0x17b   : > { %4188 = vmatmul.mubr.msk.bf16.gmra.mrb[60].mxu0 %vm1777_vm4, %v4731_v14 }
 0x17c   : > { %2114 = vmatprep.mubr.bf16.mxu0 %v4348_v3 }
 0x17d   : > { %4192 = vmatmul.mubr.msk.bf16.gmra.mrb[60].mxu1 %vm1777_vm4, %v4731_v14 }
 0x17e   : > { %2187 = vmatprep.mubr.bf16.mxu1 %v4348_v3 }
 0x183   : > { %4193 = vmatmul.mubr.msk.bf16.vlgmr.msra.gmra.mrb[64].mxu0 %vm1777_vm4, %v4670_v43 }
 0x184   : > { %2229 = vmatpush1.bf16.msra.mxu0 %v1697_v62  ;;  %2124 = vmatprep.mubr.bf16.mxu0 %v4348_v3 }
 0x185   : > { %2230 = vmatprep.subr.bf16.mxu0 %v1714_v37  ;;  %4197 = vmatmul.mubr.msk.bf16.vlgmr.msra.gmra.mrb[64].mxu1 %vm1777_vm4, %v4670_v43 }
 0x186   : > { %2302 = vmatpush1.bf16.msra.mxu1 %v1699_v9  ;;  %2197 = vmatprep.mubr.bf16.mxu1 %v4348_v3 }
 0x187   : > { %2303 = vmatprep.subr.bf16.mxu1 %v1716_v6 }
 0x188   : > { %2231 = vmatpush1.bf16.msra.mxu0 %v1713_v29 }
 0x18a   : > { %2304 = vmatpush1.bf16.msra.mxu1 %v1715_v35 }
 0x18b   : > { %4194 = vmatmul.mubr.msk.bf16.gmra.mrb[68].mxu0 %vm1777_vm4, %v4689_v12 }
 0x18c   : > { %2134 = vmatprep.mubr.bf16.mxu0 %v4348_v3 }
 0x18d   : > { %4198 = vmatmul.mubr.msk.bf16.gmra.mrb[68].mxu1 %vm1777_vm4, %v4689_v12 }
 0x18e   : > { %2207 = vmatprep.mubr.bf16.mxu1 %v4348_v3 }
 0x193   : > { %4195 = vmatmul.mubr.msk.bf16.gmra.mrb[72].mxu0 %vm1777_vm4, %v4708_v44 }
 0x194   : > { %2144 = vmatprep.mubr.bf16.mxu0 %v4348_v3 }
 0x195   : > { %4199 = vmatmul.mubr.msk.bf16.gmra.mrb[72].mxu1 %vm1777_vm4, %v4708_v44 }
 0x196   : > { %2217 = vmatprep.mubr.bf16.mxu1 %v4348_v3 }
 0x19b   : > { %4196 = vmatmul.mubr.msk.bf16.gmra.mrb[76].mxu0 %vm1777_vm4, %v4731_v14 }
 0x19c   : > { %2260 = vmatprep.mubr.bf16.mxu0 %v4348_v3 }
 0x19d   : > { %4200 = vmatmul.mubr.msk.bf16.gmra.mrb[76].mxu1 %vm1777_vm4, %v4731_v14 }
 0x19e   : > { %2333 = vmatprep.mubr.bf16.mxu1 %v4348_v3 }
 0x1a3   : > { %4201 = vmatmul.mubr.msk.bf16.vlgmr.msra.gmra.mrb[80].mxu0 %vm1777_vm4, %v4670_v43 }
 0x1a4   : > { %2270 = vmatprep.mubr.bf16.mxu0 %v4348_v3 }
 0x1a5   : > { %4205 = vmatmul.mubr.msk.bf16.vlgmr.msra.gmra.mrb[80].mxu1 %vm1777_vm4, %v4670_v43 }
 0x1a6   : > { %2343 = vmatprep.mubr.bf16.mxu1 %v4348_v3 }
 0x1ab   : > { %4202 = vmatmul.mubr.msk.bf16.gmra.mrb[84].mxu0 %vm1777_vm4, %v4689_v12 }
 0x1ac   : > { %2280 = vmatprep.mubr.bf16.mxu0 %v4348_v3 }
 0x1ad   : > { %4206 = vmatmul.mubr.msk.bf16.gmra.mrb[84].mxu1 %vm1777_vm4, %v4689_v12  ;;  %v4835_v12 = vpop.permute.xlu1 %1724 }
 0x1ae   : > { %2353 = vmatprep.mubr.bf16.mxu1 %v4348_v3 }
 0x1b1   : > { %v4847_v36 = vpop.permute.xlu1 %1734 }
 0x1b3   : > { %4203 = vmatmul.mubr.msk.bf16.gmra.mrb[88].mxu0 %vm1777_vm4, %v4708_v44 }
 0x1b4   : > { %2290 = vmatprep.mubr.bf16.mxu0 %v4348_v3 }
 0x1b5   : > { %4207 = vmatmul.mubr.msk.bf16.gmra.mrb[88].mxu1 %vm1777_vm4, %v4708_v44  ;;  %v4863_v6 = vpop.permute.xlu1 %1744 }
 0x1b6   : > { %2363 = vmatprep.mubr.bf16.mxu1 %v4348_v3 }
 0x1bb   : > { %4204 = vmatmul.mubr.msk.bf16.gmra.mrb[92].mxu0 %vm1777_vm4, %v4731_v14 }
 0x1bd   : > { %4208 = vmatmul.mubr.msk.bf16.gmra.mrb[92].mxu1 %vm1777_vm4, %v4731_v14 }
 0x216   : > { %v1824_v43 = vpop.f32.mrb[32].mxu0 }
 0x217   : > { %v1825_v33 = vadd.f32 %v1824_v43, %v4833_v4  ;;  %v1826_v38 = vpop.f32.mrb[33].mxu0 }
 0x218   : > { %v1827_v40 = vadd.f32 %v1826_v38, %v4833_v4  ;;  %v1828_v41 = vpop.f32.mrb[34].mxu0  ;;  %v1897_v44 = vpop.f32.mrb[32].mxu1 }
 0x219   : > { %v2374_v42 = vmax.f32 %v1825_v33, 0.0  ;;  %v1829_v3 = vadd.f32 %v1828_v41, %v4835_v12  ;;  %v1898_v45 = vadd.f32 %v1897_v44, %v4833_v4  ;;  %v1830_v46 = vpop.f32.mrb[35].mxu0  ;;  %v1899_v47 = vpop.f32.mrb[33].mxu1 }
 0x21a   : > { %v2375_v14 = vmax.f32 %v1827_v40, 0.0  ;;  %v1831_v48 = vadd.f32 %v1830_v46, %v4835_v12  ;;  %v1900_v49 = vadd.f32 %v1899_v47, %v4833_v4  ;;  %v1901_v50 = vpop.f32.mrb[34].mxu1 }
 0x21b   : > { %v2390_v51 = vmax.f32 %v1829_v3, 0.0  ;;  %v2376_v52 = vmax.f32 %v1898_v45, 0.0  ;;  %v1902_v53 = vadd.f32 %v1901_v50, %v4835_v12  ;;  %v1903_v54 = vpop.f32.mrb[35].mxu1 }
 0x21c   : > { %v3863_v55 = vmax.f32 %v2374_v42, %v2375_v14  ;;  %v2391_v56 = vmax.f32 %v1831_v48, 0.0  ;;  %v1904_v57 = vadd.f32 %v1903_v54, %v4835_v12  ;;  %v2377_v63 = vmax.f32 %v1900_v49, 0.0 }
 0x21d   : > { %v2392_v58 = vmax.f32 %v1902_v53, 0.0 }
 0x21e   : > { %v3864_v61 = vmax.f32 %v3863_v55, %v2376_v52  ;;  %v3880_v62 = vmax.f32 %v2390_v51, %v2391_v56  ;;  %v1834_v1 = vpop.f32.mrb[36].mxu0  ;;  %v2393_v39 = vmax.f32 %v1904_v57, 0.0 }
 0x21f   : > { %v1835_v2 = vadd.f32 %v1834_v1, %v4845_v60  ;;  %v1836_v7 = vpop.f32.mrb[37].mxu0  ;;  %v4877_v1 = vpop.permute.xlu0 %1749 }
 0x220   : > { %v4850_v8 = vmax.f32 %v3864_v61, %v2377_v63  ;;  %v3881_v9 = vmax.f32 %v3880_v62, %v2392_v58  ;;  %v1837_v10 = vadd.f32 %v1836_v7, %v4845_v60  ;;  %v1838_v11 = vpop.f32.mrb[38].mxu0  ;;  %v1907_v59 = vpop.f32.mrb[36].mxu1 }
 0x221   : > { %v2406_v13 = vmax.f32 %v1835_v2, 0.0  ;;  %v1839_v15 = vadd.f32 %v1838_v11, %v4847_v36  ;;  %v1908_v16 = vadd.f32 %v1907_v59, %v4845_v60  ;;  %v1840_v17 = vpop.f32.mrb[39].mxu0  ;;  %v1909_v18 = vpop.f32.mrb[37].mxu1 }
 0x222   : > { %v4855_v19 = vmax.f32 %v3881_v9, %v2393_v39  ;;  %v2407_v20 = vmax.f32 %v1837_v10, 0.0  ;;  %v1841_v5 = vadd.f32 %v1840_v17, %v4847_v36  ;;  %v1910_v21 = vadd.f32 %v1909_v18, %v4845_v60  ;;  %v1911_v22 = vpop.f32.mrb[38].mxu1  ;;  %v4879_v10 = vpop.permute.xlu1 %1754 }
 0x223   : > { %v2422_v23 = vmax.f32 %v1839_v15, 0.0  ;;  %v2408_v24 = vmax.f32 %v1908_v16, 0.0  ;;  %v1912_v25 = vadd.f32 %v1911_v22, %v4847_v36  ;;  %v1913_v26 = vpop.f32.mrb[39].mxu1 }
 0x224   : > { %v3897_v27 = vmax.f32 %v2406_v13, %v2407_v20  ;;  %v2423_v28 = vmax.f32 %v1841_v5, 0.0  ;;  %v1914_v29 = vadd.f32 %v1913_v26, %v4847_v36  ;;  %v2409_v34 = vmax.f32 %v1910_v21, 0.0 }
 0x225   : > { %v2424_v30 = vmax.f32 %v1912_v25, 0.0 }
 0x226   : > { %v3898_v37 = vmax.f32 %v3897_v27, %v2408_v24  ;;  %v3914_v32 = vmax.f32 %v2422_v23, %v2423_v28  ;;  %v1844_v35 = vpop.f32.mrb[40].mxu0  ;;  %v2425_v41 = vmax.f32 %v1914_v29, 0.0 }
 0x227   : > { %v1845_v43 = vadd.f32 %v1844_v35, %v4861_v31  ;;  %v1846_v33 = vpop.f32.mrb[41].mxu0 }
 0x228   : > { %v4866_v38 = vmax.f32 %v3898_v37, %v2409_v34  ;;  %v3915_v40 = vmax.f32 %v3914_v32, %v2424_v30  ;;  %v1847_v44 = vadd.f32 %v1846_v33, %v4861_v31  ;;  %v1848_v42 = vpop.f32.mrb[42].mxu0  ;;  %v1917_v3 = vpop.f32.mrb[40].mxu1 }
 0x229   : > { %v2438_v45 = vmax.f32 %v1845_v43, 0.0  ;;  %v1849_v46 = vadd.f32 %v1848_v42, %v4863_v6  ;;  %v1918_v47 = vadd.f32 %v1917_v3, %v4861_v31  ;;  %v1850_v14 = vpop.f32.mrb[43].mxu0  ;;  %v1919_v48 = vpop.f32.mrb[41].mxu1 }
 0x22a   : > { %v4871_v49 = vmax.f32 %v3915_v40, %v2425_v41  ;;  %v2439_v50 = vmax.f32 %v1847_v44, 0.0  ;;  %v1851_v51 = vadd.f32 %v1850_v14, %v4863_v6  ;;  %v1920_v52 = vadd.f32 %v1919_v48, %v4861_v31  ;;  %v1921_v53 = vpop.f32.mrb[42].mxu1 }
 0x22b   : > { %v2454_v54 = vmax.f32 %v1849_v46, 0.0  ;;  %v2440_v55 = vmax.f32 %v1918_v47, 0.0  ;;  %v1922_v56 = vadd.f32 %v1921_v53, %v4863_v6  ;;  %v1923_v57 = vpop.f32.mrb[43].mxu1 }
 0x22c   : > { %v3931_v58 = vmax.f32 %v2438_v45, %v2439_v50  ;;  %v2455_v61 = vmax.f32 %v1851_v51, 0.0  ;;  %v1924_v62 = vadd.f32 %v1923_v57, %v4863_v6  ;;  %v2441_v9 = vmax.f32 %v1920_v52, 0.0 }
 0x22d   : > { %v2456_v63 = vmax.f32 %v1922_v56, 0.0 }
 0x22e   : > { %v3932_v2 = vmax.f32 %v3931_v58, %v2440_v55  ;;  %v3948_v7 = vmax.f32 %v2454_v54, %v2455_v61  ;;  %v1854_v39 = vpop.f32.mrb[44].mxu0  ;;  %v2457_v16 = vmax.f32 %v1924_v62, 0.0 }
 0x22f   : > { %v1855_v11 = vadd.f32 %v1854_v39, %v4877_v1  ;;  %v1856_v59 = vpop.f32.mrb[45].mxu0 }
 0x230   : > { %v4882_v13 = vmax.f32 %v3932_v2, %v2441_v9  ;;  %v3949_v15 = vmax.f32 %v3948_v7, %v2456_v63  ;;  %v1857_v17 = vadd.f32 %v1856_v59, %v4877_v1  ;;  %v1858_v18 = vpop.f32.mrb[46].mxu0  ;;  %v1927_v20 = vpop.f32.mrb[44].mxu1 }
 0x231   : > { %v2470_v5 = vmax.f32 %v1855_v11, 0.0  ;;  %v1859_v21 = vadd.f32 %v1858_v18, %v4879_v10  ;;  %v1928_v22 = vadd.f32 %v1927_v20, %v4877_v1  ;;  %v1860_v23 = vpop.f32.mrb[47].mxu0  ;;  %v1929_v24 = vpop.f32.mrb[45].mxu1 }
 0x232   : > { %v4887_v25 = vmax.f32 %v3949_v15, %v2457_v16  ;;  %v2471_v26 = vmax.f32 %v1857_v17, 0.0  ;;  %v1861_v27 = vadd.f32 %v1860_v23, %v4879_v10  ;;  %v1930_v28 = vadd.f32 %v1929_v24, %v4877_v1  ;;  %v1931_v29 = vpop.f32.mrb[46].mxu1 }
 0x233   : > { %v2486_v30 = vmax.f32 %v1859_v21, 0.0  ;;  %v2472_v37 = vmax.f32 %v1928_v22, 0.0  ;;  %v1932_v32 = vadd.f32 %v1931_v29, %v4879_v10  ;;  %v1933_v34 = vpop.f32.mrb[47].mxu1 }
 0x234   : > { %v3965_v35 = vmax.f32 %v2470_v5, %v2471_v26  ;;  %v2487_v43 = vmax.f32 %v1861_v27, 0.0  ;;  %v1934_v33 = vadd.f32 %v1933_v34, %v4879_v10  ;;  %v2473_v42 = vmax.f32 %v1930_v28, 0.0 }
 0x235   : > { %v2488_v40 = vmax.f32 %v1932_v32, 0.0 }
 0x236   : > { %v3966_v41 = vmax.f32 %v3965_v35, %v2472_v37  ;;  %v3982_v44 = vmax.f32 %v2486_v30, %v2487_v43  ;;  %v1970_v3 = vpop.f32.mrb[48].mxu0  ;;  %v2489_v48 = vmax.f32 %v1934_v33, 0.0 }
 0x237   : > { %v1971_v45 = vadd.f32 %v1970_v3, %v4833_v4  ;;  %v1972_v46 = vpop.f32.mrb[49].mxu0 }
 0x238   : > { %v4894_v47 = vmax.f32 %v3966_v41, %v2473_v42  ;;  %v3983_v14 = vmax.f32 %v3982_v44, %v2488_v40  ;;  %v1973_v50 = vadd.f32 %v1972_v46, %v4833_v4  ;;  %v1974_v51 = vpop.f32.mrb[50].mxu0  ;;  %v2043_v52 = vpop.f32.mrb[48].mxu1 }
 0x239   : > { %v2378_v53 = vmax.f32 %v1971_v45, 0.0  ;;  %v1975_v54 = vadd.f32 %v1974_v51, %v4835_v12  ;;  %v2044_v55 = vadd.f32 %v2043_v52, %v4833_v4  ;;  %v1976_v56 = vpop.f32.mrb[51].mxu0  ;;  %v2045_v57 = vpop.f32.mrb[49].mxu1 }
 0x23a   : > { %v4899_v58 = vmax.f32 %v3983_v14, %v2489_v48  ;;  %v2379_v61 = vmax.f32 %v1973_v50, 0.0  ;;  %v1977_v62 = vadd.f32 %v1976_v56, %v4835_v12  ;;  %v2046_v63 = vadd.f32 %v2045_v57, %v4833_v4  ;;  %v2047_v2 = vpop.f32.mrb[50].mxu1 }
 0x23b   : > { %v3866_v7 = vmax.f32 %v4850_v8, %v2378_v53  ;;  %v2394_v9 = vmax.f32 %v1975_v54, 0.0  ;;  %v2048_v39 = vadd.f32 %v2047_v2, %v4835_v12  ;;  %v2049_v11 = vpop.f32.mrb[51].mxu1  ;;  %v2380_v18 = vmax.f32 %v2044_v55, 0.0 }
 0x23c   : > { %v2395_v59 = vmax.f32 %v1977_v62, 0.0  ;;  %v2050_v15 = vadd.f32 %v2049_v11, %v4835_v12  ;;  %v2381_v20 = vmax.f32 %v2046_v63, 0.0 }
 0x23d   : > { %v3867_v16 = vmax.f32 %v3866_v7, %v2379_v61  ;;  %v3883_v17 = vmax.f32 %v4855_v19, %v2394_v9  ;;  %v2396_v23 = vmax.f32 %v2048_v39, 0.0 }
 0x23e   : > { %v1980_v5 = vpop.f32.mrb[52].mxu0  ;;  %v2397_v8 = vmax.f32 %v2050_v15, 0.0 }
 0x23f   : > { %v3868_v21 = vmax.f32 %v3867_v16, %v2380_v18  ;;  %v3884_v22 = vmax.f32 %v3883_v17, %v2395_v59  ;;  %v1981_v24 = vadd.f32 %v1980_v5, %v4845_v60  ;;  %v1982_v26 = vpop.f32.mrb[53].mxu0 }
 0x240   : > { %v1983_v27 = vadd.f32 %v1982_v26, %v4845_v60  ;;  %v1984_v28 = vpop.f32.mrb[54].mxu0  ;;  %v2053_v29 = vpop.f32.mrb[52].mxu1 }
 0x241   : > { %v4909_v30 = vmax.f32 %v3868_v21, %v2381_v20  ;;  %v3885_v37 = vmax.f32 %v3884_v22, %v2396_v23  ;;  %v2410_v32 = vmax.f32 %v1981_v24, 0.0  ;;  %v1985_v19 = vadd.f32 %v1984_v28, %v4847_v36  ;;  %v1986_v34 = vpop.f32.mrb[55].mxu0  ;;  %v2055_v35 = vpop.f32.mrb[53].mxu1 }
 0x242   : > { %v2411_v43 = vmax.f32 %v1983_v27, 0.0  ;;  %v2054_v33 = vadd.f32 %v2053_v29, %v4845_v60  ;;  %v1987_v40 = vadd.f32 %v1986_v34, %v4847_v36  ;;  %v2056_v41 = vadd.f32 %v2055_v35, %v4845_v60  ;;  %v2057_v44 = vpop.f32.mrb[54].mxu1 }
 0x243   : > { %v4915_v42 = vmax.f32 %v3885_v37, %v2397_v8  ;;  %v3900_v3 = vmax.f32 %v4866_v38, %v2410_v32  ;;  %v2426_v45 = vmax.f32 %v1985_v19, 0.0  ;;  %v2058_v46 = vadd.f32 %v2057_v44, %v4847_v36  ;;  %v2059_v14 = vpop.f32.mrb[55].mxu1 }
 0x244   : > { %v2427_v48 = vmax.f32 %v1987_v40, 0.0  ;;  %v2060_v50 = vadd.f32 %v2059_v14, %v4847_v36  ;;  %v2412_v53 = vmax.f32 %v2054_v33, 0.0  ;;  %v2413_v54 = vmax.f32 %v2056_v41, 0.0 }
 0x245   : > { %v3901_v51 = vmax.f32 %v3900_v3, %v2411_v43  ;;  %v3917_v52 = vmax.f32 %v4871_v49, %v2426_v45  ;;  %v2428_v61 = vmax.f32 %v2058_v46, 0.0 }
 0x246   : > { %v1990_v55 = vpop.f32.mrb[56].mxu0  ;;  %v2429_v38 = vmax.f32 %v2060_v50, 0.0 }
 0x247   : > { %v3902_v56 = vmax.f32 %v3901_v51, %v2412_v53  ;;  %v3918_v57 = vmax.f32 %v3917_v52, %v2427_v48  ;;  %v1991_v62 = vadd.f32 %v1990_v55, %v4861_v31  ;;  %v1992_v63 = vpop.f32.mrb[57].mxu0 }
 0x248   : > { %v1993_v2 = vadd.f32 %v1992_v63, %v4861_v31  ;;  %v1994_v7 = vpop.f32.mrb[58].mxu0  ;;  %v2063_v9 = vpop.f32.mrb[56].mxu1 }
 0x249   : > { %v4923_v39 = vmax.f32 %v3902_v56, %v2413_v54  ;;  %v3919_v11 = vmax.f32 %v3918_v57, %v2428_v61  ;;  %v2442_v59 = vmax.f32 %v1991_v62, 0.0  ;;  %v1995_v49 = vadd.f32 %v1994_v7, %v4863_v6  ;;  %v1996_v15 = vpop.f32.mrb[59].mxu0  ;;  %v2065_v16 = vpop.f32.mrb[57].mxu1 }
 0x24a   : > { %v2443_v17 = vmax.f32 %v1993_v2, 0.0  ;;  %v2064_v18 = vadd.f32 %v2063_v9, %v4861_v31  ;;  %v1997_v20 = vadd.f32 %v1996_v15, %v4863_v6  ;;  %v2066_v5 = vadd.f32 %v2065_v16, %v4861_v31  ;;  %v2067_v21 = vpop.f32.mrb[58].mxu1 }
 0x24b   : > { %v4929_v22 = vmax.f32 %v3919_v11, %v2429_v38  ;;  %v3934_v23 = vmax.f32 %v4882_v13, %v2442_v59  ;;  %v2458_v24 = vmax.f32 %v1995_v49, 0.0  ;;  %v2068_v26 = vadd.f32 %v2067_v21, %v4863_v6  ;;  %v2069_v8 = vpop.f32.mrb[59].mxu1 }
 0x24c   : > { %v2459_v27 = vmax.f32 %v1997_v20, 0.0  ;;  %v2070_v28 = vadd.f32 %v2069_v8, %v4863_v6  ;;  %v2444_v32 = vmax.f32 %v2064_v18, 0.0  ;;  %v2445_v19 = vmax.f32 %v2066_v5, 0.0 }
 0x24d   : > { %v3935_v29 = vmax.f32 %v3934_v23, %v2443_v17  ;;  %v3951_v37 = vmax.f32 %v4887_v25, %v2458_v24  ;;  %v2460_v33 = vmax.f32 %v2068_v26, 0.0 }
 0x24e   : > { %v2000_v34 = vpop.f32.mrb[60].mxu0  ;;  %v2461_v13 = vmax.f32 %v2070_v28, 0.0 }
 0x24f   : > { %v3936_v35 = vmax.f32 %v3935_v29, %v2444_v32  ;;  %v3952_v43 = vmax.f32 %v3951_v37, %v2459_v27  ;;  %v2001_v40 = vadd.f32 %v2000_v34, %v4877_v1  ;;  %v2002_v41 = vpop.f32.mrb[61].mxu0 }
 0x250   : > { %v2003_v44 = vadd.f32 %v2002_v41, %v4877_v1  ;;  %v2004_v3 = vpop.f32.mrb[62].mxu0  ;;  %v2073_v45 = vpop.f32.mrb[60].mxu1 }
 0x251   : > { %v4937_v46 = vmax.f32 %v3936_v35, %v2445_v19  ;;  %v3953_v14 = vmax.f32 %v3952_v43, %v2460_v33  ;;  %v2474_v48 = vmax.f32 %v2001_v40, 0.0  ;;  %v2005_v25 = vadd.f32 %v2004_v3, %v4879_v10  ;;  %v2006_v50 = vpop.f32.mrb[63].mxu0  ;;  %v2075_v51 = vpop.f32.mrb[61].mxu1 }
 0x252   : > { %v2475_v52 = vmax.f32 %v2003_v44, 0.0  ;;  %v2074_v53 = vadd.f32 %v2073_v45, %v4877_v1  ;;  %v2007_v54 = vadd.f32 %v2006_v50, %v4879_v10  ;;  %v2076_v55 = vadd.f32 %v2075_v51, %v4877_v1  ;;  %v2077_v56 = vpop.f32.mrb[62].mxu1 }
 0x253   : > { %v4943_v57 = vmax.f32 %v3953_v14, %v2461_v13  ;;  %v3968_v61 = vmax.f32 %v4894_v47, %v2474_v48  ;;  %v2490_v62 = vmax.f32 %v2005_v25, 0.0  ;;  %v2078_v63 = vadd.f32 %v2077_v56, %v4879_v10  ;;  %v2079_v38 = vpop.f32.mrb[63].mxu1 }
 0x254   : > { %v2491_v2 = vmax.f32 %v2007_v54, 0.0  ;;  %v2080_v7 = vadd.f32 %v2079_v38, %v4879_v10  ;;  %v2476_v59 = vmax.f32 %v2074_v53, 0.0  ;;  %v2477_v49 = vmax.f32 %v2076_v55, 0.0 }
 0x255   : > { %v3969_v9 = vmax.f32 %v3968_v61, %v2475_v52  ;;  %v3985_v11 = vmax.f32 %v4899_v58, %v2490_v62  ;;  %v2492_v18 = vmax.f32 %v2078_v63, 0.0 }
 0x256   : > { %v2116_v15 = vpop.f32.mrb[64].mxu0  ;;  %v2493_v47 = vmax.f32 %v2080_v7, 0.0 }
 0x257   : > { %v3970_v16 = vmax.f32 %v3969_v9, %v2476_v59  ;;  %v3986_v17 = vmax.f32 %v3985_v11, %v2491_v2  ;;  %v2117_v20 = vadd.f32 %v2116_v15, %v4833_v4  ;;  %v2118_v5 = vpop.f32.mrb[65].mxu0 }
 0x258   : > { %v2119_v21 = vadd.f32 %v2118_v5, %v4833_v4  ;;  %v2120_v23 = vpop.f32.mrb[66].mxu0  ;;  %v2189_v24 = vpop.f32.mrb[64].mxu1 }
 0x259   : > { %v4951_v26 = vmax.f32 %v3970_v16, %v2477_v49  ;;  %v3987_v8 = vmax.f32 %v3986_v17, %v2492_v18  ;;  %v2382_v27 = vmax.f32 %v2117_v20, 0.0  ;;  %v2121_v58 = vadd.f32 %v2120_v23, %v4835_v12  ;;  %v2122_v28 = vpop.f32.mrb[67].mxu0  ;;  %v2191_v29 = vpop.f32.mrb[65].mxu1 }
 0x25a   : > { %v2383_v37 = vmax.f32 %v2119_v21, 0.0  ;;  %v2190_v32 = vadd.f32 %v2189_v24, %v4833_v4  ;;  %v2123_v19 = vadd.f32 %v2122_v28, %v4835_v12  ;;  %v2192_v34 = vadd.f32 %v2191_v29, %v4833_v4  ;;  %v2193_v35 = vpop.f32.mrb[66].mxu1 }
 0x25b   : > { %v4957_v43 = vmax.f32 %v3987_v8, %v2493_v47  ;;  %v3870_v33 = vmax.f32 %v4909_v30, %v2382_v27  ;;  %v2398_v40 = vmax.f32 %v2121_v58, 0.0  ;;  %v2194_v41 = vadd.f32 %v2193_v35, %v4835_v12  ;;  %v2195_v13 = vpop.f32.mrb[67].mxu1 }
 0x25c   : > { %v2399_v44 = vmax.f32 %v2123_v19, 0.0  ;;  %v2196_v3 = vadd.f32 %v2195_v13, %v4835_v12  ;;  %v2384_v48 = vmax.f32 %v2190_v32, 0.0  ;;  %v2385_v25 = vmax.f32 %v2192_v34, 0.0 }
 0x25d   : > { %v3871_v45 = vmax.f32 %v3870_v33, %v2383_v37  ;;  %v3887_v14 = vmax.f32 %v4915_v42, %v2398_v40  ;;  %v2400_v53 = vmax.f32 %v2194_v41, 0.0 }
 0x25e   : > { %v2126_v50 = vpop.f32.mrb[68].mxu0  ;;  %v2401_v30 = vmax.f32 %v2196_v3, 0.0 }
 0x25f   : > { %v3872_v51 = vmax.f32 %v3871_v45, %v2384_v48  ;;  %v3888_v52 = vmax.f32 %v3887_v14, %v2399_v44  ;;  %v2127_v54 = vadd.f32 %v2126_v50, %v4845_v60  ;;  %v2128_v55 = vpop.f32.mrb[69].mxu0 }
 0x260   : > { %v2129_v56 = vadd.f32 %v2128_v55, %v4845_v60  ;;  %v2130_v61 = vpop.f32.mrb[70].mxu0  ;;  %v2199_v62 = vpop.f32.mrb[68].mxu1 }
 0x261   : > { %v4965_v63 = vmax.f32 %v3872_v51, %v2385_v25  ;;  %v3889_v38 = vmax.f32 %v3888_v52, %v2400_v53  ;;  %v2414_v2 = vmax.f32 %v2127_v54, 0.0  ;;  %v2131_v42 = vadd.f32 %v2130_v61, %v4847_v36  ;;  %v2132_v7 = vpop.f32.mrb[71].mxu0  ;;  %v2201_v9 = vpop.f32.mrb[69].mxu1 }
 0x262   : > { %v2415_v11 = vmax.f32 %v2129_v56, 0.0  ;;  %v2200_v59 = vadd.f32 %v2199_v62, %v4845_v60  ;;  %v2133_v49 = vadd.f32 %v2132_v7, %v4847_v36  ;;  %v2202_v15 = vadd.f32 %v2201_v9, %v4845_v60  ;;  %v2203_v16 = vpop.f32.mrb[70].mxu1 }
 0x263   : > { %v4971_v17 = vmax.f32 %v3889_v38, %v2401_v30  ;;  %v3904_v18 = vmax.f32 %v4923_v39, %v2414_v2  ;;  %v2430_v20 = vmax.f32 %v2131_v42, 0.0  ;;  %v2204_v5 = vadd.f32 %v2203_v16, %v4847_v36  ;;  %v2205_v47 = vpop.f32.mrb[71].mxu1 }
 0x264   : > { %v2431_v21 = vmax.f32 %v2133_v49, 0.0  ;;  %v2206_v23 = vadd.f32 %v2205_v47, %v4847_v36  ;;  %v2416_v27 = vmax.f32 %v2200_v59, 0.0  ;;  %v2417_v58 = vmax.f32 %v2202_v15, 0.0 }
 0x265   : > { %v3905_v24 = vmax.f32 %v3904_v18, %v2415_v11  ;;  %v3921_v8 = vmax.f32 %v4929_v22, %v2430_v20  ;;  %v2432_v32 = vmax.f32 %v2204_v5, 0.0  ;;  %v2510_v5 = vand.u32 127, %v409_v0 }
 0x266   : > { %v2136_v28 = vpop.f32.mrb[72].mxu0  ;;  %v2433_v39 = vmax.f32 %v2206_v23, 0.0 }
 0x267   : > { %v3906_v29 = vmax.f32 %v3905_v24, %v2416_v27  ;;  %v3922_v37 = vmax.f32 %v3921_v8, %v2431_v21  ;;  %v2137_v19 = vadd.f32 %v2136_v28, %v4861_v31  ;;  %v2138_v34 = vpop.f32.mrb[73].mxu0 }
 0x268   : > { %v2139_v35 = vadd.f32 %v2138_v34, %v4861_v31  ;;  %v2140_v33 = vpop.f32.mrb[74].mxu0  ;;  %v2209_v40 = vpop.f32.mrb[72].mxu1 }
 0x269   : > { %v4979_v41 = vmax.f32 %v3906_v29, %v2417_v58  ;;  %v3923_v13 = vmax.f32 %v3922_v37, %v2432_v32  ;;  %v2446_v44 = vmax.f32 %v2137_v19, 0.0  ;;  %v2141_v22 = vadd.f32 %v2140_v33, %v4863_v6  ;;  %v2142_v3 = vpop.f32.mrb[75].mxu0  ;;  %v2211_v45 = vpop.f32.mrb[73].mxu1 }
 0x26a   : > { %v2447_v14 = vmax.f32 %v2139_v35, 0.0  ;;  %v2210_v48 = vadd.f32 %v2209_v40, %v4861_v31  ;;  %v2143_v25 = vadd.f32 %v2142_v3, %v4863_v6  ;;  %v2212_v50 = vadd.f32 %v2211_v45, %v4861_v31  ;;  %v2213_v51 = vpop.f32.mrb[74].mxu1 }
 0x26b   : > { %v4985_v52 = vmax.f32 %v3923_v13, %v2433_v39  ;;  %v3938_v53 = vmax.f32 %v4937_v46, %v2446_v44  ;;  %v2462_v54 = vmax.f32 %v2141_v22, 0.0  ;;  %v2214_v55 = vadd.f32 %v2213_v51, %v4863_v6  ;;  %v2215_v30 = vpop.f32.mrb[75].mxu1 }
 0x26c   : > { %v2463_v56 = vmax.f32 %v2143_v25, 0.0  ;;  %v2216_v61 = vadd.f32 %v2215_v30, %v4863_v6  ;;  %v2448_v2 = vmax.f32 %v2210_v48, 0.0  ;;  %v2449_v42 = vmax.f32 %v2212_v50, 0.0 }
 0x26d   : > { %v3939_v62 = vmax.f32 %v3938_v53, %v2447_v14  ;;  %v3955_v38 = vmax.f32 %v4943_v57, %v2462_v54  ;;  %v2464_v59 = vmax.f32 %v2214_v55, 0.0  ;;  %v5006_v45 = vadd.s32 1792, %v2510_v5 }
 0x26e   : > { %v2146_v7 = vpop.f32.mrb[76].mxu0  ;;  %v2465_v46 = vmax.f32 %v2216_v61, 0.0 }
 0x26f   : > { %v3940_v9 = vmax.f32 %v3939_v62, %v2448_v2  ;;  %v3956_v11 = vmax.f32 %v3955_v38, %v2463_v56  ;;  %v2147_v49 = vadd.f32 %v2146_v7, %v4877_v1  ;;  %v2148_v15 = vpop.f32.mrb[77].mxu0  ;;  %vm2557_vm5 = vcmp.lt.s32.totalorder %v5006_v45, 1900 }
 0x270   : > { %v2149_v16 = vadd.f32 %v2148_v15, %v4877_v1  ;;  %v2150_v18 = vpop.f32.mrb[78].mxu0  ;;  %v2219_v20 = vpop.f32.mrb[76].mxu1 }
 0x271   : > { %v4994_v47 = vmax.f32 %v3940_v9, %v2449_v42  ;;  %v3957_v21 = vmax.f32 %v3956_v11, %v2464_v59  ;;  %v2478_v57 = vmax.f32 %v2147_v49, 0.0  ;;  %v2151_v23 = vadd.f32 %v2150_v18, %v4879_v10  ;;  %v2152_v24 = vpop.f32.mrb[79].mxu0  ;;  %v2221_v8 = vpop.f32.mrb[77].mxu1 }
 0x272   : > { %v2479_v27 = vmax.f32 %v2149_v16, 0.0  ;;  %v2220_v58 = vadd.f32 %v2219_v20, %v4877_v1  ;;  %v2153_v28 = vadd.f32 %v2152_v24, %v4879_v10  ;;  %v2222_v29 = vadd.f32 %v2221_v8, %v4877_v1  ;;  %v2223_v37 = vpop.f32.mrb[78].mxu1 }
 0x273   : > { %v5000_v32 = vmax.f32 %v3957_v21, %v2465_v46  ;;  %v3972_v0 = vmax.f32 %v4951_v26, %v2478_v57  ;;  %v2494_v19 = vmax.f32 %v2151_v23, 0.0  ;;  %v2224_v34 = vadd.f32 %v2223_v37, %v4879_v10  ;;  %v2225_v39 = vpop.f32.mrb[79].mxu1 }
 0x274   : > { %v2495_v35 = vmax.f32 %v2153_v28, 0.0  ;;  %v2226_v33 = vadd.f32 %v2225_v39, %v4879_v10  ;;  %v2480_v44 = vmax.f32 %v2220_v58, 0.0  ;;  %v2481_v22 = vmax.f32 %v2222_v29, 0.0 }
 0x275   : > { %v3973_v40 = vmax.f32 %v3972_v0, %v2479_v27  ;;  %v3989_v13 = vmax.f32 %v4957_v43, %v2494_v19  ;;  %v2496_v25 = vmax.f32 %v2224_v34, 0.0 }
 0x276   : > { %v2262_v3 = vpop.f32.mrb[80].mxu0  ;;  %v2497_v51 = vmax.f32 %v2226_v33, 0.0 }
 0x277   : > { %v3974_v14 = vmax.f32 %v3973_v40, %v2480_v44  ;;  %v3990_v48 = vmax.f32 %v3989_v13, %v2495_v35  ;;  %v2263_v26 = vadd.f32 %v2262_v3, %v4833_v4  ;;  %v2264_v50 = vpop.f32.mrb[81].mxu0 }
 0x278   : > { %v2265_v53 = vadd.f32 %v2264_v50, %v4833_v4  ;;  %v2266_v54 = vpop.f32.mrb[82].mxu0  ;;  %v2335_v55 = vpop.f32.mrb[80].mxu1 }
 0x279   : > { %v5010_v30 = vmax.f32 %v3974_v14, %v2481_v22  ;;  %v3991_v56 = vmax.f32 %v3990_v48, %v2496_v25  ;;  %v2386_v43 = vmax.f32 %v2263_v26, 0.0  ;;  %v2267_v61 = vadd.f32 %v2266_v54, %v4835_v12  ;;  %v2268_v62 = vpop.f32.mrb[83].mxu0  ;;  %v2337_v38 = vpop.f32.mrb[81].mxu1 }
 0x27a   : > { %v2387_v2 = vmax.f32 %v2265_v53, 0.0  ;;  %v2336_v42 = vadd.f32 %v2335_v55, %v4833_v4  ;;  %v2269_v7 = vadd.f32 %v2268_v62, %v4835_v12  ;;  %v2339_v9 = vpop.f32.mrb[82].mxu1 }
 0x27b   : > { %v5016_v11 = vmax.f32 %v3991_v56, %v2497_v51  ;;  %v3874_v59 = vmax.f32 %v4965_v63, %v2386_v43  ;;  %v2402_v49 = vmax.f32 %v2267_v61, 0.0  ;;  %v2340_v15 = vadd.f32 %v2339_v9, %v4835_v12  ;;  %v2341_v46 = vpop.f32.mrb[83].mxu1 }
 0x27c   : > { %v2388_v16 = vmax.f32 %v2336_v42, 0.0  ;;  %v2403_v18 = vmax.f32 %v2269_v7, 0.0 }
 0x27d   : > { %v3875_v20 = vmax.f32 %v3874_v59, %v2387_v2  ;;  %v3891_v5 = vmax.f32 %v4971_v17, %v2402_v49  ;;  %v2404_v21 = vmax.f32 %v2340_v15, 0.0 }
 0x27e   : > { %v2272_v4 = vpop.f32.mrb[84].mxu0  ;;  %v2573_v57 = vsel %vm2557_vm5, %v2388_v16, 0.0 }
 0x27f   : > { %v3892_v23 = vmax.f32 %v3891_v5, %v2403_v18  ;;  %v2273_v24 = vadd.f32 %v2272_v4, %v4845_v60  ;;  %v2274_v8 = vpop.f32.mrb[85].mxu0  ;;  %v3876_v27 = vmax.f32 %v3875_v20, %v2573_v57  ;;  %v2589_v63 = vsel %vm2557_vm5, %v2404_v21, 0.0 }
 0x280   : > { %v2275_v12 = vadd.f32 %v2274_v8, %v4845_v60  ;;  %v2276_v58 = vpop.f32.mrb[86].mxu0  ;;  %v2345_v28 = vpop.f32.mrb[84].mxu1 }
 0x281   : > { %v2418_v29 = vmax.f32 %v2273_v24, 0.0  ;;  %v2277_v17 = vadd.f32 %v2276_v58, %v4847_v36  ;;  %v2346_v37 = vadd.f32 %v2345_v28, %v4845_v60  ;;  %v2278_v0 = vpop.f32.mrb[87].mxu0  ;;  %v2347_v19 = vpop.f32.mrb[85].mxu1  ;;  %v3877_v34 = vmax.f32 %v3876_v27, 0.0 }
 0x282   : > { %v2419_v39 = vmax.f32 %v2275_v12, 0.0  ;;  %v2279_v35 = vadd.f32 %v2278_v0, %v4847_v36  ;;  %v2349_v33 = vpop.f32.mrb[86].mxu1  ;;  %v3893_v40 = vmax.f32 %v3892_v23, %v2589_v63 }
 0x283   : > { %v3908_v13 = vmax.f32 %v4979_v41, %v2418_v29  ;;  %v2434_v44 = vmax.f32 %v2277_v17, 0.0  ;;  %v2420_v22 = vmax.f32 %v2346_v37, 0.0  ;;  %v2350_v3 = vadd.f32 %v2349_v33, %v4847_v36  ;;  %3878 = vmax.xlane.f32.xlu0 %v3877_v34  ;;  %v2351_v14 = vpop.f32.mrb[87].mxu1 }
 0x284   : > { %v2435_v48 = vmax.f32 %v2279_v35, 0.0  ;;  %v3894_v25 = vmax.f32 %v3893_v40, 0.0 }
 0x285   : > { %v3909_v26 = vmax.f32 %v3908_v13, %v2419_v39  ;;  %v3925_v60 = vmax.f32 %v4985_v52, %v2434_v44  ;;  %v2436_v50 = vmax.f32 %v2350_v3, 0.0  ;;  %v2605_v51 = vsel %vm2557_vm5, %v2420_v22, 0.0 }
 0x286   : > { %3895 = vmax.xlane.f32.xlu1 %v3894_v25  ;;  %v2282_v53 = vpop.f32.mrb[88].mxu0 }
 0x287   : > { %v3926_v54 = vmax.f32 %v3925_v60, %v2435_v48  ;;  %v2283_v41 = vadd.f32 %v2282_v53, %v4861_v31  ;;  %v2284_v55 = vpop.f32.mrb[89].mxu0  ;;  %v3910_v56 = vmax.f32 %v3909_v26, %v2605_v51  ;;  %v2621_v36 = vsel %vm2557_vm5, %v2436_v50, 0.0 }
 0x288   : > { %v2285_v43 = vadd.f32 %v2284_v55, %v4861_v31  ;;  %v2286_v61 = vpop.f32.mrb[90].mxu0  ;;  %v2355_v62 = vpop.f32.mrb[88].mxu1 }
 0x289   : > { %v2450_v38 = vmax.f32 %v2283_v41, 0.0  ;;  %v2287_v52 = vadd.f32 %v2286_v61, %v4863_v6  ;;  %v2356_v2 = vadd.f32 %v2355_v62, %v4861_v31  ;;  %v2288_v42 = vpop.f32.mrb[91].mxu0  ;;  %v2357_v7 = vpop.f32.mrb[89].mxu1  ;;  %v3911_v9 = vmax.f32 %v3910_v56, 0.0 }
 0x28a   : > { %v2451_v59 = vmax.f32 %v2285_v43, 0.0  ;;  %v2289_v49 = vadd.f32 %v2288_v42, %v4863_v6  ;;  %v2359_v15 = vpop.f32.mrb[90].mxu1  ;;  %v3927_v46 = vmax.f32 %v3926_v54, %v2621_v36 }
 0x28b   : > { %v3942_v16 = vmax.f32 %v4994_v47, %v2450_v38  ;;  %v2466_v18 = vmax.f32 %v2287_v52, 0.0  ;;  %v2452_v20 = vmax.f32 %v2356_v2, 0.0  ;;  %v2360_v5 = vadd.f32 %v2359_v15, %v4863_v6  ;;  %3912 = vmax.xlane.f32.xlu0 %v3911_v9  ;;  %v2361_v21 = vpop.f32.mrb[91].mxu1 }
 0x28c   : > { %v2467_v4 = vmax.f32 %v2289_v49, 0.0  ;;  %v3928_v57 = vmax.f32 %v3927_v46, 0.0 }
 0x28d   : > { %v3943_v23 = vmax.f32 %v3942_v16, %v2451_v59  ;;  %v3959_v31 = vmax.f32 %v5000_v32, %v2466_v18  ;;  %v2468_v24 = vmax.f32 %v2360_v5, 0.0  ;;  %v2637_v8 = vsel %vm2557_vm5, %v2452_v20, 0.0 }
 0x28e   : > { %v2292_v27 = vpop.f32.mrb[92].mxu0 }
 0x28f   : > { %v3960_v63 = vmax.f32 %v3959_v31, %v2467_v4  ;;  %v2293_v12 = vadd.f32 %v2292_v27, %v4877_v1  ;;  %v2294_v47 = vpop.f32.mrb[93].mxu0  ;;  %3929 = vmax.xlane.f32.xlu0 %v3928_v57  ;;  %v3944_v58 = vmax.f32 %v3943_v23, %v2637_v8  ;;  %v2653_v6 = vsel %vm2557_vm5, %v2468_v24, 0.0 }
 0x290   : > { %v2295_v28 = vadd.f32 %v2294_v47, %v4877_v1  ;;  %v2296_v29 = vpop.f32.mrb[94].mxu0  ;;  %v2365_v17 = vpop.f32.mrb[92].mxu1 }
 0x291   : > { %v2482_v37 = vmax.f32 %v2293_v12, 0.0  ;;  %v2297_v32 = vadd.f32 %v2296_v29, %v4879_v10  ;;  %v2366_v0 = vadd.f32 %v2365_v17, %v4877_v1  ;;  %v2298_v19 = vpop.f32.mrb[95].mxu0  ;;  %v2367_v34 = vpop.f32.mrb[93].mxu1  ;;  %v3945_v39 = vmax.f32 %v3944_v58, 0.0 }
 0x292   : > { %v2483_v35 = vmax.f32 %v2295_v28, 0.0  ;;  %v2299_v33 = vadd.f32 %v2298_v19, %v4879_v10  ;;  %v2369_v40 = vpop.f32.mrb[94].mxu1  ;;  %v3961_v13 = vmax.f32 %v3960_v63, %v2653_v6 }
 0x293   : > { %v3976_v44 = vmax.f32 %v5010_v30, %v2482_v37  ;;  %v2498_v22 = vmax.f32 %v2297_v32, 0.0  ;;  %v2484_v3 = vmax.f32 %v2366_v0, 0.0  ;;  %v2370_v14 = vadd.f32 %v2369_v40, %v4879_v10  ;;  %3946 = vmax.xlane.f32.xlu1 %v3945_v39  ;;  %v2371_v48 = vpop.f32.mrb[95].mxu1 }
 0x294   : > { %v2499_v25 = vmax.f32 %v2299_v33, 0.0  ;;  %v3962_v26 = vmax.f32 %v3961_v13, 0.0 }
 0x295   : > { %v3977_v1 = vmax.f32 %v3976_v44, %v2483_v35  ;;  %v3993_v60 = vmax.f32 %v5016_v11, %v2498_v22  ;;  %v2500_v50 = vmax.f32 %v2370_v14, 0.0  ;;  %v2669_v51 = vsel %vm2557_vm5, %v2484_v3, 0.0 }
 0x296   : > { %3963 = vmax.xlane.f32.xlu0 %v3962_v26 }
 0x297   : > { %v3994_v53 = vmax.f32 %v3993_v60, %v2499_v25  ;;  %v3978_v54 = vmax.f32 %v3977_v1, %v2669_v51  ;;  %v2685_v30 = vsel %vm2557_vm5, %v2500_v50, 0.0 }
 0x299   : > { %v3979_v41 = vmax.f32 %v3978_v54, 0.0  ;;  %v3995_v10 = vmax.f32 %v3994_v53, %v2685_v30 }
 0x29b   : > { %3980 = vmax.xlane.f32.xlu1 %v3979_v41  ;;  %v3996_v55 = vmax.f32 %v3995_v10, 0.0 }
 0x29d   : > { %3997 = vmax.xlane.f32.xlu0 %v3996_v55 }
 0x310   : > { %v3879_v11 = vpop.xlane.xlu0 %3878 }
 0x311   : > { %4000 = vst.msk [vmem:[%s373_s17] sm:$0xff] %vm3999_vm6, %v3879_v11 }
 0x313   : > { %v3896_v56 = vpop.xlane.xlu1 %3895 }
 0x314   : > { %4001 = vst.msk [vmem:[%s373_s17 + $0x8] sm:$0xff] %vm3999_vm6, %v3896_v56 }
 0x318   : > { %v3913_v36 = vpop.xlane.xlu0 %3912 }
 0x319   : > { %4002 = vst.msk [vmem:[%s373_s17 + $0x10] sm:$0xff] %vm3999_vm6, %v3913_v36 }
 0x31c   : > { %v3930_v45 = vpop.xlane.xlu0 %3929 }
 0x31d   : > { %4003 = vst.msk [vmem:[%s373_s17 + $0x18] sm:$0xff] %vm3999_vm6, %v3930_v45 }
 0x320   : > { %v3947_v43 = vpop.xlane.xlu1 %3946 }
 0x321   : > { %4004 = vst.msk [vmem:[%s373_s17 + $0x20] sm:$0xff] %vm3999_vm6, %v3947_v43 }
 0x323   : > { %v3964_v61 = vpop.xlane.xlu0 %3963 }
 0x324   : > { %4005 = vst.msk [vmem:[%s373_s17 + $0x28] sm:$0xff] %vm3999_vm6, %v3964_v61 }
 0x328   : > { %v3981_v62 = vpop.xlane.xlu1 %3980 }
 0x329   : > { %4006 = vst.msk [vmem:[%s373_s17 + $0x30] sm:$0xff] %vm3999_vm6, %v3981_v62 }
 0x32a   : > { %v3998_v38 = vpop.xlane.xlu0 %3997 }
 0x32b   : > { %4007 = vst.msk [vmem:[%s373_s17 + $0x38] sm:$0xff] %vm3999_vm6, %v3998_v38 }
 0x32c PF: > { %s17_s26 = sadd.s32 1, %s4345_s26   ;;  %s5090_s24 = smov %s4341_s25 }
 0x32d   : > { %p14_p5 = scmp.ge.s32.totalorder %s17_s26, 4   ;;  %s5091_s25 = smov %s5093_s27 }
 0x32f   :  { %16 = sbr.rel (!%p14_p5) target bundleno = 2 (0x2), region = 109 }

</bundles_post_ra>
